<compile_context>
chip_gen: v7x
topology: tpu7x:2x2x1
jax: 0.10.0
libtpu: 0.0.40
codegen_flags: <defaults>
</compile_context>

<pallas_src>
import jax
import jax.numpy as jnp
from jax import lax
from jax.experimental import pallas as pl
from jax.experimental.pallas import tpu as pltpu

EMBEDDING_DIM = 100
HIDDEN_DIM = 100
VOCAB_SIZE = 7872
NUM_TAGS = 44

LANE = 128                 # padded width for E, H, and each gate band
GATES_PAD = 4 * LANE       # 512
TAGS_PAD = 128             # padded tag (output) width
NEG_FILL = -1e30           # bias fill for padded tag lanes (softmax mass -> 0)


def lstm_tagger_kernel(emb_ref, wih_ref, whh_ref, b_ref, wlin_hbm, blin_hbm,
                       out_ref, xw_ref, hall_ref, wlin_vmem, blin_vmem, dma_sem):
    """emb_ref:(T,128) VMEM   wih_ref:(128,512) VMEM   whh_ref:(128,512) VMEM
    b_ref:(1,512) VMEM        wlin_hbm:(128,128) HBM   blin_hbm:(1,128) HBM
    out_ref:(T,128) VMEM
    scratch: xw_ref:(T,512)  hall_ref:(T,128)  wlin_vmem:(128,128)  blin_vmem:(1,128)
             dma_sem: DMA semaphores (2,)."""
    T = emb_ref.shape[0]
    HP = whh_ref.shape[0]  # 128

    # Classifier weights are only needed after the recurrence: start their DMA now
    # so it overlaps the serial LSTM steps (free latency hide).
    wlin_cp = pltpu.make_async_copy(wlin_hbm, wlin_vmem, dma_sem.at[0])
    blin_cp = pltpu.make_async_copy(blin_hbm, blin_vmem, dma_sem.at[1])
    wlin_cp.start()
    blin_cp.start()

    # Hoisted input projection + fused bias: one batched matmul with M=T instead of
    # T serial (1,E)@(E,4H) pushes inside the recurrence.
    xw_ref[...] = (jnp.dot(emb_ref[...], wih_ref[...],
                           preferred_element_type=jnp.float32) + b_ref[...])

    w_hh = whh_ref[...]  # loop-invariant, loaded once

    def step(t, carry):
        h, c = carry                                            # (1,HP) each
        gates = xw_ref[pl.ds(t, 1), :] + jnp.dot(
            h, w_hh, preferred_element_type=jnp.float32)        # (1, 4*HP)
        # 128-lane-aligned gate bands -> plain vreg selects, no cross-lane XLU work.
        i_g = jax.nn.sigmoid(gates[:, 0 * HP:1 * HP])
        f_g = jax.nn.sigmoid(gates[:, 1 * HP:2 * HP])
        g_g = jnp.tanh(gates[:, 2 * HP:3 * HP])
        o_g = jax.nn.sigmoid(gates[:, 3 * HP:4 * HP])
        c_new = f_g * c + i_g * g_g
        h_new = o_g * jnp.tanh(c_new)
        hall_ref[pl.ds(t, 1), :] = h_new
        return (h_new, c_new)

    h0 = jnp.zeros((1, HP), jnp.float32)
    c0 = jnp.zeros((1, HP), jnp.float32)
    # T is static; full unroll exposes the short recurrence to the LLO scheduler.
    lax.fori_loop(0, T, step, (h0, c0), unroll=True)

    # Classifier weights must have landed by now (DMA had the whole recurrence to hide).
    wlin_cp.wait()
    blin_cp.wait()

    # Tag classifier + softmax over rows. Padded tag lanes carry NEG_FILL bias, so
    # exp underflows to exactly 0 there and the real 44 columns match the reference.
    logits = jnp.dot(hall_ref[...], wlin_vmem[...],
                     preferred_element_type=jnp.float32) + blin_vmem[...]
    m = jnp.max(logits, axis=1, keepdims=True)
    e = jnp.exp(logits - m)
    denom = jnp.sum(e, axis=1, keepdims=True)
    # EUP approximate reciprocal + one Newton refinement (keeps f32 accuracy).
    inv = pl.reciprocal(denom, approx=True)
    inv = inv * (2.0 - denom * inv)
    out_ref[...] = e * inv


def init_params(key):
    """Deterministic synthetic parameters matching torch.nn module shapes."""
    ks = jax.random.split(key, 7)
    scale = 0.1
    emb_table = jax.random.normal(ks[0], (VOCAB_SIZE, EMBEDDING_DIM), jnp.float32)
    w_ih = scale * jax.random.normal(ks[1], (4 * HIDDEN_DIM, EMBEDDING_DIM), jnp.float32)
    w_hh = scale * jax.random.normal(ks[2], (4 * HIDDEN_DIM, HIDDEN_DIM), jnp.float32)
    b_ih = scale * jax.random.normal(ks[3], (4 * HIDDEN_DIM,), jnp.float32)
    b_hh = scale * jax.random.normal(ks[4], (4 * HIDDEN_DIM,), jnp.float32)
    w_lin = scale * jax.random.normal(ks[5], (NUM_TAGS, HIDDEN_DIM), jnp.float32)
    b_lin = scale * jax.random.normal(ks[6], (NUM_TAGS,), jnp.float32)
    return dict(emb_table=emb_table, w_ih=w_ih, w_hh=w_hh,
                b_ih=b_ih, b_hh=b_hh, w_lin=w_lin, b_lin=b_lin)


def _pad_gate_bands(w_t, h, hp):
    """w_t: (in_dim, 4*h) with PyTorch gate order i,f,g,o -> (in_dim, 4*hp),
    each gate band zero-padded from h to hp columns (lane-aligned bands)."""
    blocks = [jnp.pad(w_t[:, g * h:(g + 1) * h], ((0, 0), (0, hp - h)))
              for g in range(4)]
    return jnp.concatenate(blocks, axis=1)


def prepare_padded_params(params):
    """One-time layout prep: fold biases, pad all weights / the embedding table to
    lane-aligned widths. Done once at init so the per-call path has no pad/concat."""
    H = HIDDEN_DIM
    emb_table_p = jnp.pad(params["emb_table"],
                          ((0, 0), (0, LANE - EMBEDDING_DIM)))      # (V, 128)

    wih_t = params["w_ih"].T                                        # (E, 4H)
    whh_t = params["w_hh"].T                                        # (H, 4H)
    bias = (params["b_ih"] + params["b_hh"]).reshape(1, -1)         # (1, 4H)

    wih_p = jnp.pad(_pad_gate_bands(wih_t, H, LANE),
                    ((0, LANE - EMBEDDING_DIM), (0, 0)))            # (128, 512)
    whh_p = jnp.pad(_pad_gate_bands(whh_t, H, LANE),
                    ((0, LANE - H), (0, 0)))                        # (128, 512)
    bias_p = _pad_gate_bands(bias, H, LANE)                         # (1, 512)

    wlin_p = jnp.pad(params["w_lin"].T,
                     ((0, LANE - H), (0, TAGS_PAD - NUM_TAGS)))     # (128, 128)
    blin_p = jnp.pad(params["b_lin"].reshape(1, -1),
                     ((0, 0), (0, TAGS_PAD - NUM_TAGS)),
                     constant_values=NEG_FILL)                      # (1, 128)

    return dict(emb_table_p=emb_table_p, wih_p=wih_p, whh_p=whh_p,
                bias_p=bias_p, wlin_p=wlin_p, blin_p=blin_p)


@jax.jit
def lstm_tagger_forward(token_ids, padded):
    """Per-call path: embedding gather on the pre-padded table + the Pallas kernel."""
    emb_p = jnp.take(padded["emb_table_p"], token_ids, axis=0)      # (T, 128)
    T = emb_p.shape[0]

    vmem = pl.BlockSpec(memory_space=pltpu.MemorySpace.VMEM)
    hbm = pl.BlockSpec(memory_space=pl.ANY)   # classifier weights: manual overlapped DMA

    probs_p = pl.pallas_call(
        lstm_tagger_kernel,
        out_shape=jax.ShapeDtypeStruct((T, TAGS_PAD), jnp.float32),
        in_specs=[vmem, vmem, vmem, vmem, hbm, hbm],
        out_specs=vmem,
        scratch_shapes=[pltpu.VMEM((T, GATES_PAD), jnp.float32),    # xW + bias
                        pltpu.VMEM((T, LANE), jnp.float32),         # h_all
                        pltpu.VMEM((LANE, TAGS_PAD), jnp.float32),  # W_lin (DMA dst)
                        pltpu.VMEM((1, TAGS_PAD), jnp.float32),     # b_lin (DMA dst)
                        pltpu.SemaphoreType.DMA((2,))],
    )(emb_p, padded["wih_p"], padded["whh_p"], padded["bias_p"],
      padded["wlin_p"], padded["blin_p"])
    return probs_p[:, :NUM_TAGS]


def reference_forward(token_ids, params):
    """Pure-JAX reference of the PyTorch forward (for a sanity check)."""
    embeds = jnp.take(params["emb_table"], token_ids, axis=0)
    H = HIDDEN_DIM
    w_ih, w_hh = params["w_ih"], params["w_hh"]
    bias = params["b_ih"] + params["b_hh"]

    def step(carry, x):
        h, c = carry
        gates = x @ w_ih.T + h @ w_hh.T + bias
        i_g = jax.nn.sigmoid(gates[0 * H:1 * H])
        f_g = jax.nn.sigmoid(gates[1 * H:2 * H])
        g_g = jnp.tanh(gates[2 * H:3 * H])
        o_g = jax.nn.sigmoid(gates[3 * H:4 * H])
        c_new = f_g * c + i_g * g_g
        h_new = o_g * jnp.tanh(c_new)
        return (h_new, c_new), h_new

    h0 = jnp.zeros((H,), jnp.float32)
    c0 = jnp.zeros((H,), jnp.float32)
    _, h_all = lax.scan(step, (h0, c0), embeds)
    logits = h_all @ params["w_lin"].T + params["b_lin"]
    return jax.nn.softmax(logits, axis=1)


if __name__ == "__main__":
    key = jax.random.PRNGKey(0)
    k_param, k_tok = jax.random.split(key)
    params = init_params(k_param)

    # One-time layout prep (canonical padded params; not on the per-call path).
    padded = jax.tree_util.tree_map(jax.block_until_ready,
                                    prepare_padded_params(params))

    SEQ_LEN = 8
    token_ids = jax.random.randint(k_tok, (SEQ_LEN,), 0, VOCAB_SIZE, dtype=jnp.int32)

    probs = lstm_tagger_forward(token_ids, padded)
    probs = jax.block_until_ready(probs)

    ref = reference_forward(token_ids, params)
    assert probs.shape == (SEQ_LEN, NUM_TAGS)
    assert jnp.allclose(probs, ref, atol=1e-4, rtol=1e-4), "mismatch vs reference"
    assert jnp.allclose(jnp.sum(probs, axis=1), 1.0, atol=1e-4)

    print("KERNEL_OK")
</pallas_src>

<mosaic_0001>
module attributes {stable_mosaic.version = 11 : i64} {
  func.func @lstm_tagger_kernel(%arg0: memref<8x128xf32, #tpu.memory_space<vmem>>, %arg1: memref<128x512xf32, #tpu.memory_space<vmem>>, %arg2: memref<128x512xf32, #tpu.memory_space<vmem>>, %arg3: memref<1x512xf32, #tpu.memory_space<vmem>>, %arg4: memref<128x128xf32, #tpu.memory_space<any>>, %arg5: memref<1x128xf32, #tpu.memory_space<any>>, %arg6: memref<8x128xf32, #tpu.memory_space<vmem>>, %arg7: memref<8x512xf32, #tpu.memory_space<vmem>>, %arg8: memref<8x128xf32, #tpu.memory_space<vmem>>, %arg9: memref<128x128xf32, #tpu.memory_space<vmem>>, %arg10: memref<1x128xf32, #tpu.memory_space<vmem>>, %arg11: memref<2x!tpu.dma_semaphore, #tpu.memory_space<semaphore_mem>>) attributes {dimension_semantics = [], scalar_prefetch = 0 : i64, scratch_operands = 5 : i64, tpu.core_type = #tpu.core_type<tc>} {
    %c0_i32 = arith.constant 0 : i32
    %0 = tpu.memref_slice %arg11[%c0_i32] : memref<2x!tpu.dma_semaphore, #tpu.memory_space<semaphore_mem>> -> memref<1x!tpu.dma_semaphore, #tpu.memory_space<semaphore_mem>>
    %1 = tpu.memref_squeeze %0 : memref<1x!tpu.dma_semaphore, #tpu.memory_space<semaphore_mem>> -> memref<!tpu.dma_semaphore, #tpu.memory_space<semaphore_mem>>
    tpu.enqueue_dma source(%arg4 : memref<128x128xf32, #tpu.memory_space<any>>) target(%arg9 : memref<128x128xf32, #tpu.memory_space<vmem>>) target_semaphore(%1 : memref<!tpu.dma_semaphore, #tpu.memory_space<semaphore_mem>>)
    %c1_i32 = arith.constant 1 : i32
    %2 = tpu.memref_slice %arg11[%c1_i32] : memref<2x!tpu.dma_semaphore, #tpu.memory_space<semaphore_mem>> -> memref<1x!tpu.dma_semaphore, #tpu.memory_space<semaphore_mem>>
    %3 = tpu.memref_squeeze %2 : memref<1x!tpu.dma_semaphore, #tpu.memory_space<semaphore_mem>> -> memref<!tpu.dma_semaphore, #tpu.memory_space<semaphore_mem>>
    tpu.enqueue_dma source(%arg5 : memref<1x128xf32, #tpu.memory_space<any>>) target(%arg10 : memref<1x128xf32, #tpu.memory_space<vmem>>) target_semaphore(%3 : memref<!tpu.dma_semaphore, #tpu.memory_space<semaphore_mem>>)
    %c0 = arith.constant 0 : index
    %c0_0 = arith.constant 0 : index
    %4 = vector.load %arg0[%c0, %c0_0] : memref<8x128xf32, #tpu.memory_space<vmem>>, vector<8x128xf32>
    %c0_1 = arith.constant 0 : index
    %c0_2 = arith.constant 0 : index
    %5 = vector.load %arg1[%c0_1, %c0_2] : memref<128x512xf32, #tpu.memory_space<vmem>>, vector<128x512xf32>
    %cst = arith.constant dense<0.000000e+00> : vector<8x512xf32>
    %6 = tpu.matmul %4, %5, %cst {dimension_numbers = #tpu.dot_dimension_numbers<[1], [0], [0], [1], [0, 0, 1, 1], [], []>} : vector<8x128xf32>, vector<128x512xf32>, vector<8x512xf32> -> vector<8x512xf32>
    %c0_3 = arith.constant 0 : index
    %c0_4 = arith.constant 0 : index
    %7 = vector.load %arg3[%c0_3, %c0_4] : memref<1x512xf32, #tpu.memory_space<vmem>>, vector<1x512xf32>
    %8 = vector.broadcast %7 : vector<1x512xf32> to vector<8x512xf32>
    %9 = arith.addf %6, %8 : vector<8x512xf32>
    %c0_5 = arith.constant 0 : index
    %c0_6 = arith.constant 0 : index
    %10 = vector.load %arg7[%c0_5, %c0_6] : memref<8x512xf32, #tpu.memory_space<vmem>>, vector<8x512xf32>
    tpu.vector_store %arg7[%c0_5, %c0_6], %9 {strides = array<i32>} : memref<8x512xf32, #tpu.memory_space<vmem>>, vector<8x512xf32>,
    %c0_7 = arith.constant 0 : index
    %c0_8 = arith.constant 0 : index
    %11 = vector.load %arg2[%c0_7, %c0_8] : memref<128x512xf32, #tpu.memory_space<vmem>>, vector<128x512xf32>
    %cst_9 = arith.constant 0.000000e+00 : f32
    %12 = vector.broadcast %cst_9 : f32 to vector<1x128xf32>
    %cst_10 = arith.constant 0.000000e+00 : f32
    %13 = vector.broadcast %cst_10 : f32 to vector<1x128xf32>
    %c0_i32_11 = arith.constant 0 : i32
    %14 = arith.index_cast %c0_i32_11 : i32 to index
    %c0_12 = arith.constant 0 : index
    %15 = vector.load %arg7[%14, %c0_12] : memref<8x512xf32, #tpu.memory_space<vmem>>, vector<1x512xf32>
    %cst_13 = arith.constant dense<0.000000e+00> : vector<1x512xf32>
    %16 = tpu.matmul %12, %11, %cst_13 {dimension_numbers = #tpu.dot_dimension_numbers<[1], [0], [0], [1], [0, 0, 1, 1], [], []>} : vector<1x128xf32>, vector<128x512xf32>, vector<1x512xf32> -> vector<1x512xf32>
    %17 = arith.addf %15, %16 : vector<1x512xf32>
    %18 = vector.extract_strided_slice %17 {offsets = [0, 0], sizes = [1, 128], strides = [1, 1]} : vector<1x512xf32> to vector<1x128xf32>
    %19 = arith.negf %18 : vector<1x128xf32>
    %20 = math.exp %19 : vector<1x128xf32>
    %cst_14 = arith.constant 1.000000e+00 : f32
    %21 = vector.broadcast %cst_14 : f32 to vector<1x128xf32>
    %22 = arith.addf %21, %20 : vector<1x128xf32>
    %23 = arith.divf %21, %22 : vector<1x128xf32>
    %24 = vector.extract_strided_slice %17 {offsets = [0, 128], sizes = [1, 128], strides = [1, 1]} : vector<1x512xf32> to vector<1x128xf32>
    %25 = arith.negf %24 : vector<1x128xf32>
    %26 = math.exp %25 : vector<1x128xf32>
    %cst_15 = arith.constant 1.000000e+00 : f32
    %27 = vector.broadcast %cst_15 : f32 to vector<1x128xf32>
    %28 = arith.addf %27, %26 : vector<1x128xf32>
    %29 = arith.divf %27, %28 : vector<1x128xf32>
    %30 = vector.extract_strided_slice %17 {offsets = [0, 256], sizes = [1, 128], strides = [1, 1]} : vector<1x512xf32> to vector<1x128xf32>
    %31 = math.tanh %30 : vector<1x128xf32>
    %32 = vector.extract_strided_slice %17 {offsets = [0, 384], sizes = [1, 128], strides = [1, 1]} : vector<1x512xf32> to vector<1x128xf32>
    %33 = arith.negf %32 : vector<1x128xf32>
    %34 = math.exp %33 : vector<1x128xf32>
    %cst_16 = arith.constant 1.000000e+00 : f32
    %35 = vector.broadcast %cst_16 : f32 to vector<1x128xf32>
    %36 = arith.addf %35, %34 : vector<1x128xf32>
    %37 = arith.divf %35, %36 : vector<1x128xf32>
    %38 = arith.mulf %29, %13 : vector<1x128xf32>
    %39 = arith.mulf %23, %31 : vector<1x128xf32>
    %40 = arith.addf %38, %39 : vector<1x128xf32>
    %41 = math.tanh %40 : vector<1x128xf32>
    %42 = arith.mulf %37, %41 : vector<1x128xf32>
    %43 = arith.index_cast %c0_i32_11 : i32 to index
    %c0_17 = arith.constant 0 : index
    %44 = vector.load %arg8[%43, %c0_17] : memref<8x128xf32, #tpu.memory_space<vmem>>, vector<1x128xf32>
    tpu.vector_store %arg8[%43, %c0_17], %42 {strides = array<i32>} : memref<8x128xf32, #tpu.memory_space<vmem>>, vector<1x128xf32>,
    %c1_i32_18 = arith.constant 1 : i32
    %45 = arith.index_cast %c1_i32_18 : i32 to index
    %c0_19 = arith.constant 0 : index
    %46 = vector.load %arg7[%45, %c0_19] : memref<8x512xf32, #tpu.memory_space<vmem>>, vector<1x512xf32>
    %cst_20 = arith.constant dense<0.000000e+00> : vector<1x512xf32>
    %47 = tpu.matmul %42, %11, %cst_20 {dimension_numbers = #tpu.dot_dimension_numbers<[1], [0], [0], [1], [0, 0, 1, 1], [], []>} : vector<1x128xf32>, vector<128x512xf32>, vector<1x512xf32> -> vector<1x512xf32>
    %48 = arith.addf %46, %47 : vector<1x512xf32>
    %49 = vector.extract_strided_slice %48 {offsets = [0, 0], sizes = [1, 128], strides = [1, 1]} : vector<1x512xf32> to vector<1x128xf32>
    %50 = arith.negf %49 : vector<1x128xf32>
    %51 = math.exp %50 : vector<1x128xf32>
    %cst_21 = arith.constant 1.000000e+00 : f32
    %52 = vector.broadcast %cst_21 : f32 to vector<1x128xf32>
    %53 = arith.addf %52, %51 : vector<1x128xf32>
    %54 = arith.divf %52, %53 : vector<1x128xf32>
    %55 = vector.extract_strided_slice %48 {offsets = [0, 128], sizes = [1, 128], strides = [1, 1]} : vector<1x512xf32> to vector<1x128xf32>
    %56 = arith.negf %55 : vector<1x128xf32>
    %57 = math.exp %56 : vector<1x128xf32>
    %cst_22 = arith.constant 1.000000e+00 : f32
    %58 = vector.broadcast %cst_22 : f32 to vector<1x128xf32>
    %59 = arith.addf %58, %57 : vector<1x128xf32>
    %60 = arith.divf %58, %59 : vector<1x128xf32>
    %61 = vector.extract_strided_slice %48 {offsets = [0, 256], sizes = [1, 128], strides = [1, 1]} : vector<1x512xf32> to vector<1x128xf32>
    %62 = math.tanh %61 : vector<1x128xf32>
    %63 = vector.extract_strided_slice %48 {offsets = [0, 384], sizes = [1, 128], strides = [1, 1]} : vector<1x512xf32> to vector<1x128xf32>
    %64 = arith.negf %63 : vector<1x128xf32>
    %65 = math.exp %64 : vector<1x128xf32>
    %cst_23 = arith.constant 1.000000e+00 : f32
    %66 = vector.broadcast %cst_23 : f32 to vector<1x128xf32>
    %67 = arith.addf %66, %65 : vector<1x128xf32>
    %68 = arith.divf %66, %67 : vector<1x128xf32>
    %69 = arith.mulf %60, %40 : vector<1x128xf32>
    %70 = arith.mulf %54, %62 : vector<1x128xf32>
    %71 = arith.addf %69, %70 : vector<1x128xf32>
    %72 = math.tanh %71 : vector<1x128xf32>
    %73 = arith.mulf %68, %72 : vector<1x128xf32>
    %74 = arith.index_cast %c1_i32_18 : i32 to index
    %c0_24 = arith.constant 0 : index
    %75 = vector.load %arg8[%74, %c0_24] : memref<8x128xf32, #tpu.memory_space<vmem>>, vector<1x128xf32>
    tpu.vector_store %arg8[%74, %c0_24], %73 {strides = array<i32>} : memref<8x128xf32, #tpu.memory_space<vmem>>, vector<1x128xf32>,
    %c2_i32 = arith.constant 2 : i32
    %76 = arith.index_cast %c2_i32 : i32 to index
    %c0_25 = arith.constant 0 : index
    %77 = vector.load %arg7[%76, %c0_25] : memref<8x512xf32, #tpu.memory_space<vmem>>, vector<1x512xf32>
    %cst_26 = arith.constant dense<0.000000e+00> : vector<1x512xf32>
    %78 = tpu.matmul %73, %11, %cst_26 {dimension_numbers = #tpu.dot_dimension_numbers<[1], [0], [0], [1], [0, 0, 1, 1], [], []>} : vector<1x128xf32>, vector<128x512xf32>, vector<1x512xf32> -> vector<1x512xf32>
    %79 = arith.addf %77, %78 : vector<1x512xf32>
    %80 = vector.extract_strided_slice %79 {offsets = [0, 0], sizes = [1, 128], strides = [1, 1]} : vector<1x512xf32> to vector<1x128xf32>
    %81 = arith.negf %80 : vector<1x128xf32>
    %82 = math.exp %81 : vector<1x128xf32>
    %cst_27 = arith.constant 1.000000e+00 : f32
    %83 = vector.broadcast %cst_27 : f32 to vector<1x128xf32>
    %84 = arith.addf %83, %82 : vector<1x128xf32>
    %85 = arith.divf %83, %84 : vector<1x128xf32>
    %86 = vector.extract_strided_slice %79 {offsets = [0, 128], sizes = [1, 128], strides = [1, 1]} : vector<1x512xf32> to vector<1x128xf32>
    %87 = arith.negf %86 : vector<1x128xf32>
    %88 = math.exp %87 : vector<1x128xf32>
    %cst_28 = arith.constant 1.000000e+00 : f32
    %89 = vector.broadcast %cst_28 : f32 to vector<1x128xf32>
    %90 = arith.addf %89, %88 : vector<1x128xf32>
    %91 = arith.divf %89, %90 : vector<1x128xf32>
    %92 = vector.extract_strided_slice %79 {offsets = [0, 256], sizes = [1, 128], strides = [1, 1]} : vector<1x512xf32> to vector<1x128xf32>
    %93 = math.tanh %92 : vector<1x128xf32>
    %94 = vector.extract_strided_slice %79 {offsets = [0, 384], sizes = [1, 128], strides = [1, 1]} : vector<1x512xf32> to vector<1x128xf32>
    %95 = arith.negf %94 : vector<1x128xf32>
    %96 = math.exp %95 : vector<1x128xf32>
    %cst_29 = arith.constant 1.000000e+00 : f32
    %97 = vector.broadcast %cst_29 : f32 to vector<1x128xf32>
    %98 = arith.addf %97, %96 : vector<1x128xf32>
    %99 = arith.divf %97, %98 : vector<1x128xf32>
    %100 = arith.mulf %91, %71 : vector<1x128xf32>
    %101 = arith.mulf %85, %93 : vector<1x128xf32>
    %102 = arith.addf %100, %101 : vector<1x128xf32>
    %103 = math.tanh %102 : vector<1x128xf32>
    %104 = arith.mulf %99, %103 : vector<1x128xf32>
    %105 = arith.index_cast %c2_i32 : i32 to index
    %c0_30 = arith.constant 0 : index
    %106 = vector.load %arg8[%105, %c0_30] : memref<8x128xf32, #tpu.memory_space<vmem>>, vector<1x128xf32>
    tpu.vector_store %arg8[%105, %c0_30], %104 {strides = array<i32>} : memref<8x128xf32, #tpu.memory_space<vmem>>, vector<1x128xf32>,
    %c3_i32 = arith.constant 3 : i32
    %107 = arith.index_cast %c3_i32 : i32 to index
    %c0_31 = arith.constant 0 : index
    %108 = vector.load %arg7[%107, %c0_31] : memref<8x512xf32, #tpu.memory_space<vmem>>, vector<1x512xf32>
    %cst_32 = arith.constant dense<0.000000e+00> : vector<1x512xf32>
    %109 = tpu.matmul %104, %11, %cst_32 {dimension_numbers = #tpu.dot_dimension_numbers<[1], [0], [0], [1], [0, 0, 1, 1], [], []>} : vector<1x128xf32>, vector<128x512xf32>, vector<1x512xf32> -> vector<1x512xf32>
    %110 = arith.addf %108, %109 : vector<1x512xf32>
    %111 = vector.extract_strided_slice %110 {offsets = [0, 0], sizes = [1, 128], strides = [1, 1]} : vector<1x512xf32> to vector<1x128xf32>
    %112 = arith.negf %111 : vector<1x128xf32>
    %113 = math.exp %112 : vector<1x128xf32>
    %cst_33 = arith.constant 1.000000e+00 : f32
    %114 = vector.broadcast %cst_33 : f32 to vector<1x128xf32>
    %115 = arith.addf %114, %113 : vector<1x128xf32>
    %116 = arith.divf %114, %115 : vector<1x128xf32>
    %117 = vector.extract_strided_slice %110 {offsets = [0, 128], sizes = [1, 128], strides = [1, 1]} : vector<1x512xf32> to vector<1x128xf32>
    %118 = arith.negf %117 : vector<1x128xf32>
    %119 = math.exp %118 : vector<1x128xf32>
    %cst_34 = arith.constant 1.000000e+00 : f32
    %120 = vector.broadcast %cst_34 : f32 to vector<1x128xf32>
    %121 = arith.addf %120, %119 : vector<1x128xf32>
    %122 = arith.divf %120, %121 : vector<1x128xf32>
    %123 = vector.extract_strided_slice %110 {offsets = [0, 256], sizes = [1, 128], strides = [1, 1]} : vector<1x512xf32> to vector<1x128xf32>
    %124 = math.tanh %123 : vector<1x128xf32>
    %125 = vector.extract_strided_slice %110 {offsets = [0, 384], sizes = [1, 128], strides = [1, 1]} : vector<1x512xf32> to vector<1x128xf32>
    %126 = arith.negf %125 : vector<1x128xf32>
    %127 = math.exp %126 : vector<1x128xf32>
    %cst_35 = arith.constant 1.000000e+00 : f32
    %128 = vector.broadcast %cst_35 : f32 to vector<1x128xf32>
    %129 = arith.addf %128, %127 : vector<1x128xf32>
    %130 = arith.divf %128, %129 : vector<1x128xf32>
    %131 = arith.mulf %122, %102 : vector<1x128xf32>
    %132 = arith.mulf %116, %124 : vector<1x128xf32>
    %133 = arith.addf %131, %132 : vector<1x128xf32>
    %134 = math.tanh %133 : vector<1x128xf32>
    %135 = arith.mulf %130, %134 : vector<1x128xf32>
    %136 = arith.index_cast %c3_i32 : i32 to index
    %c0_36 = arith.constant 0 : index
    %137 = vector.load %arg8[%136, %c0_36] : memref<8x128xf32, #tpu.memory_space<vmem>>, vector<1x128xf32>
    tpu.vector_store %arg8[%136, %c0_36], %135 {strides = array<i32>} : memref<8x128xf32, #tpu.memory_space<vmem>>, vector<1x128xf32>,
    %c4_i32 = arith.constant 4 : i32
    %138 = arith.index_cast %c4_i32 : i32 to index
    %c0_37 = arith.constant 0 : index
    %139 = vector.load %arg7[%138, %c0_37] : memref<8x512xf32, #tpu.memory_space<vmem>>, vector<1x512xf32>
    %cst_38 = arith.constant dense<0.000000e+00> : vector<1x512xf32>
    %140 = tpu.matmul %135, %11, %cst_38 {dimension_numbers = #tpu.dot_dimension_numbers<[1], [0], [0], [1], [0, 0, 1, 1], [], []>} : vector<1x128xf32>, vector<128x512xf32>, vector<1x512xf32> -> vector<1x512xf32>
    %141 = arith.addf %139, %140 : vector<1x512xf32>
    %142 = vector.extract_strided_slice %141 {offsets = [0, 0], sizes = [1, 128], strides = [1, 1]} : vector<1x512xf32> to vector<1x128xf32>
    %143 = arith.negf %142 : vector<1x128xf32>
    %144 = math.exp %143 : vector<1x128xf32>
    %cst_39 = arith.constant 1.000000e+00 : f32
    %145 = vector.broadcast %cst_39 : f32 to vector<1x128xf32>
    %146 = arith.addf %145, %144 : vector<1x128xf32>
    %147 = arith.divf %145, %146 : vector<1x128xf32>
    %148 = vector.extract_strided_slice %141 {offsets = [0, 128], sizes = [1, 128], strides = [1, 1]} : vector<1x512xf32> to vector<1x128xf32>
    %149 = arith.negf %148 : vector<1x128xf32>
    %150 = math.exp %149 : vector<1x128xf32>
    %cst_40 = arith.constant 1.000000e+00 : f32
    %151 = vector.broadcast %cst_40 : f32 to vector<1x128xf32>
    %152 = arith.addf %151, %150 : vector<1x128xf32>
    %153 = arith.divf %151, %152 : vector<1x128xf32>
    %154 = vector.extract_strided_slice %141 {offsets = [0, 256], sizes = [1, 128], strides = [1, 1]} : vector<1x512xf32> to vector<1x128xf32>
    %155 = math.tanh %154 : vector<1x128xf32>
    %156 = vector.extract_strided_slice %141 {offsets = [0, 384], sizes = [1, 128], strides = [1, 1]} : vector<1x512xf32> to vector<1x128xf32>
    %157 = arith.negf %156 : vector<1x128xf32>
    %158 = math.exp %157 : vector<1x128xf32>
    %cst_41 = arith.constant 1.000000e+00 : f32
    %159 = vector.broadcast %cst_41 : f32 to vector<1x128xf32>
    %160 = arith.addf %159, %158 : vector<1x128xf32>
    %161 = arith.divf %159, %160 : vector<1x128xf32>
    %162 = arith.mulf %153, %133 : vector<1x128xf32>
    %163 = arith.mulf %147, %155 : vector<1x128xf32>
    %164 = arith.addf %162, %163 : vector<1x128xf32>
    %165 = math.tanh %164 : vector<1x128xf32>
    %166 = arith.mulf %161, %165 : vector<1x128xf32>
    %167 = arith.index_cast %c4_i32 : i32 to index
    %c0_42 = arith.constant 0 : index
    %168 = vector.load %arg8[%167, %c0_42] : memref<8x128xf32, #tpu.memory_space<vmem>>, vector<1x128xf32>
    tpu.vector_store %arg8[%167, %c0_42], %166 {strides = array<i32>} : memref<8x128xf32, #tpu.memory_space<vmem>>, vector<1x128xf32>,
    %c5_i32 = arith.constant 5 : i32
    %169 = arith.index_cast %c5_i32 : i32 to index
    %c0_43 = arith.constant 0 : index
    %170 = vector.load %arg7[%169, %c0_43] : memref<8x512xf32, #tpu.memory_space<vmem>>, vector<1x512xf32>
    %cst_44 = arith.constant dense<0.000000e+00> : vector<1x512xf32>
    %171 = tpu.matmul %166, %11, %cst_44 {dimension_numbers = #tpu.dot_dimension_numbers<[1], [0], [0], [1], [0, 0, 1, 1], [], []>} : vector<1x128xf32>, vector<128x512xf32>, vector<1x512xf32> -> vector<1x512xf32>
    %172 = arith.addf %170, %171 : vector<1x512xf32>
    %173 = vector.extract_strided_slice %172 {offsets = [0, 0], sizes = [1, 128], strides = [1, 1]} : vector<1x512xf32> to vector<1x128xf32>
    %174 = arith.negf %173 : vector<1x128xf32>
    %175 = math.exp %174 : vector<1x128xf32>
    %cst_45 = arith.constant 1.000000e+00 : f32
    %176 = vector.broadcast %cst_45 : f32 to vector<1x128xf32>
    %177 = arith.addf %176, %175 : vector<1x128xf32>
    %178 = arith.divf %176, %177 : vector<1x128xf32>
    %179 = vector.extract_strided_slice %172 {offsets = [0, 128], sizes = [1, 128], strides = [1, 1]} : vector<1x512xf32> to vector<1x128xf32>
    %180 = arith.negf %179 : vector<1x128xf32>
    %181 = math.exp %180 : vector<1x128xf32>
    %cst_46 = arith.constant 1.000000e+00 : f32
    %182 = vector.broadcast %cst_46 : f32 to vector<1x128xf32>
    %183 = arith.addf %182, %181 : vector<1x128xf32>
    %184 = arith.divf %182, %183 : vector<1x128xf32>
    %185 = vector.extract_strided_slice %172 {offsets = [0, 256], sizes = [1, 128], strides = [1, 1]} : vector<1x512xf32> to vector<1x128xf32>
    %186 = math.tanh %185 : vector<1x128xf32>
    %187 = vector.extract_strided_slice %172 {offsets = [0, 384], sizes = [1, 128], strides = [1, 1]} : vector<1x512xf32> to vector<1x128xf32>
    %188 = arith.negf %187 : vector<1x128xf32>
    %189 = math.exp %188 : vector<1x128xf32>
    %cst_47 = arith.constant 1.000000e+00 : f32
    %190 = vector.broadcast %cst_47 : f32 to vector<1x128xf32>
    %191 = arith.addf %190, %189 : vector<1x128xf32>
    %192 = arith.divf %190, %191 : vector<1x128xf32>
    %193 = arith.mulf %184, %164 : vector<1x128xf32>
    %194 = arith.mulf %178, %186 : vector<1x128xf32>
    %195 = arith.addf %193, %194 : vector<1x128xf32>
    %196 = math.tanh %195 : vector<1x128xf32>
    %197 = arith.mulf %192, %196 : vector<1x128xf32>
    %198 = arith.index_cast %c5_i32 : i32 to index
    %c0_48 = arith.constant 0 : index
    %199 = vector.load %arg8[%198, %c0_48] : memref<8x128xf32, #tpu.memory_space<vmem>>, vector<1x128xf32>
    tpu.vector_store %arg8[%198, %c0_48], %197 {strides = array<i32>} : memref<8x128xf32, #tpu.memory_space<vmem>>, vector<1x128xf32>,
    %c6_i32 = arith.constant 6 : i32
    %200 = arith.index_cast %c6_i32 : i32 to index
    %c0_49 = arith.constant 0 : index
    %201 = vector.load %arg7[%200, %c0_49] : memref<8x512xf32, #tpu.memory_space<vmem>>, vector<1x512xf32>
    %cst_50 = arith.constant dense<0.000000e+00> : vector<1x512xf32>
    %202 = tpu.matmul %197, %11, %cst_50 {dimension_numbers = #tpu.dot_dimension_numbers<[1], [0], [0], [1], [0, 0, 1, 1], [], []>} : vector<1x128xf32>, vector<128x512xf32>, vector<1x512xf32> -> vector<1x512xf32>
    %203 = arith.addf %201, %202 : vector<1x512xf32>
    %204 = vector.extract_strided_slice %203 {offsets = [0, 0], sizes = [1, 128], strides = [1, 1]} : vector<1x512xf32> to vector<1x128xf32>
    %205 = arith.negf %204 : vector<1x128xf32>
    %206 = math.exp %205 : vector<1x128xf32>
    %cst_51 = arith.constant 1.000000e+00 : f32
    %207 = vector.broadcast %cst_51 : f32 to vector<1x128xf32>
    %208 = arith.addf %207, %206 : vector<1x128xf32>
    %209 = arith.divf %207, %208 : vector<1x128xf32>
    %210 = vector.extract_strided_slice %203 {offsets = [0, 128], sizes = [1, 128], strides = [1, 1]} : vector<1x512xf32> to vector<1x128xf32>
    %211 = arith.negf %210 : vector<1x128xf32>
    %212 = math.exp %211 : vector<1x128xf32>
    %cst_52 = arith.constant 1.000000e+00 : f32
    %213 = vector.broadcast %cst_52 : f32 to vector<1x128xf32>
    %214 = arith.addf %213, %212 : vector<1x128xf32>
    %215 = arith.divf %213, %214 : vector<1x128xf32>
    %216 = vector.extract_strided_slice %203 {offsets = [0, 256], sizes = [1, 128], strides = [1, 1]} : vector<1x512xf32> to vector<1x128xf32>
    %217 = math.tanh %216 : vector<1x128xf32>
    %218 = vector.extract_strided_slice %203 {offsets = [0, 384], sizes = [1, 128], strides = [1, 1]} : vector<1x512xf32> to vector<1x128xf32>
    %219 = arith.negf %218 : vector<1x128xf32>
    %220 = math.exp %219 : vector<1x128xf32>
    %cst_53 = arith.constant 1.000000e+00 : f32
    %221 = vector.broadcast %cst_53 : f32 to vector<1x128xf32>
    %222 = arith.addf %221, %220 : vector<1x128xf32>
    %223 = arith.divf %221, %222 : vector<1x128xf32>
    %224 = arith.mulf %215, %195 : vector<1x128xf32>
    %225 = arith.mulf %209, %217 : vector<1x128xf32>
    %226 = arith.addf %224, %225 : vector<1x128xf32>
    %227 = math.tanh %226 : vector<1x128xf32>
    %228 = arith.mulf %223, %227 : vector<1x128xf32>
    %229 = arith.index_cast %c6_i32 : i32 to index
    %c0_54 = arith.constant 0 : index
    %230 = vector.load %arg8[%229, %c0_54] : memref<8x128xf32, #tpu.memory_space<vmem>>, vector<1x128xf32>
    tpu.vector_store %arg8[%229, %c0_54], %228 {strides = array<i32>} : memref<8x128xf32, #tpu.memory_space<vmem>>, vector<1x128xf32>,
    %c7_i32 = arith.constant 7 : i32
    %231 = arith.index_cast %c7_i32 : i32 to index
    %c0_55 = arith.constant 0 : index
    %232 = vector.load %arg7[%231, %c0_55] : memref<8x512xf32, #tpu.memory_space<vmem>>, vector<1x512xf32>
    %cst_56 = arith.constant dense<0.000000e+00> : vector<1x512xf32>
    %233 = tpu.matmul %228, %11, %cst_56 {dimension_numbers = #tpu.dot_dimension_numbers<[1], [0], [0], [1], [0, 0, 1, 1], [], []>} : vector<1x128xf32>, vector<128x512xf32>, vector<1x512xf32> -> vector<1x512xf32>
    %234 = arith.addf %232, %233 : vector<1x512xf32>
    %235 = vector.extract_strided_slice %234 {offsets = [0, 0], sizes = [1, 128], strides = [1, 1]} : vector<1x512xf32> to vector<1x128xf32>
    %236 = arith.negf %235 : vector<1x128xf32>
    %237 = math.exp %236 : vector<1x128xf32>
    %cst_57 = arith.constant 1.000000e+00 : f32
    %238 = vector.broadcast %cst_57 : f32 to vector<1x128xf32>
    %239 = arith.addf %238, %237 : vector<1x128xf32>
    %240 = arith.divf %238, %239 : vector<1x128xf32>
    %241 = vector.extract_strided_slice %234 {offsets = [0, 128], sizes = [1, 128], strides = [1, 1]} : vector<1x512xf32> to vector<1x128xf32>
    %242 = arith.negf %241 : vector<1x128xf32>
    %243 = math.exp %242 : vector<1x128xf32>
    %cst_58 = arith.constant 1.000000e+00 : f32
    %244 = vector.broadcast %cst_58 : f32 to vector<1x128xf32>
    %245 = arith.addf %244, %243 : vector<1x128xf32>
    %246 = arith.divf %244, %245 : vector<1x128xf32>
    %247 = vector.extract_strided_slice %234 {offsets = [0, 256], sizes = [1, 128], strides = [1, 1]} : vector<1x512xf32> to vector<1x128xf32>
    %248 = math.tanh %247 : vector<1x128xf32>
    %249 = vector.extract_strided_slice %234 {offsets = [0, 384], sizes = [1, 128], strides = [1, 1]} : vector<1x512xf32> to vector<1x128xf32>
    %250 = arith.negf %249 : vector<1x128xf32>
    %251 = math.exp %250 : vector<1x128xf32>
    %cst_59 = arith.constant 1.000000e+00 : f32
    %252 = vector.broadcast %cst_59 : f32 to vector<1x128xf32>
    %253 = arith.addf %252, %251 : vector<1x128xf32>
    %254 = arith.divf %252, %253 : vector<1x128xf32>
    %255 = arith.mulf %246, %226 : vector<1x128xf32>
    %256 = arith.mulf %240, %248 : vector<1x128xf32>
    %257 = arith.addf %255, %256 : vector<1x128xf32>
    %258 = math.tanh %257 : vector<1x128xf32>
    %259 = arith.mulf %254, %258 : vector<1x128xf32>
    %260 = arith.index_cast %c7_i32 : i32 to index
    %c0_60 = arith.constant 0 : index
    %261 = vector.load %arg8[%260, %c0_60] : memref<8x128xf32, #tpu.memory_space<vmem>>, vector<1x128xf32>
    tpu.vector_store %arg8[%260, %c0_60], %259 {strides = array<i32>} : memref<8x128xf32, #tpu.memory_space<vmem>>, vector<1x128xf32>,
    %c8_i32 = arith.constant 8 : i32
    %c0_i32_61 = arith.constant 0 : i32
    %262 = tpu.memref_slice %arg11[%c0_i32_61] : memref<2x!tpu.dma_semaphore, #tpu.memory_space<semaphore_mem>> -> memref<1x!tpu.dma_semaphore, #tpu.memory_space<semaphore_mem>>
    %263 = tpu.memref_squeeze %262 : memref<1x!tpu.dma_semaphore, #tpu.memory_space<semaphore_mem>> -> memref<!tpu.dma_semaphore, #tpu.memory_space<semaphore_mem>>
    tpu.wait_dma2 semaphore(%263 : memref<!tpu.dma_semaphore, #tpu.memory_space<semaphore_mem>>) src(%arg4 : memref<128x128xf32, #tpu.memory_space<any>>) dst(%arg9 : memref<128x128xf32, #tpu.memory_space<vmem>>)
    %c1_i32_62 = arith.constant 1 : i32
    %264 = tpu.memref_slice %arg11[%c1_i32_62] : memref<2x!tpu.dma_semaphore, #tpu.memory_space<semaphore_mem>> -> memref<1x!tpu.dma_semaphore, #tpu.memory_space<semaphore_mem>>
    %265 = tpu.memref_squeeze %264 : memref<1x!tpu.dma_semaphore, #tpu.memory_space<semaphore_mem>> -> memref<!tpu.dma_semaphore, #tpu.memory_space<semaphore_mem>>
    tpu.wait_dma2 semaphore(%265 : memref<!tpu.dma_semaphore, #tpu.memory_space<semaphore_mem>>) src(%arg5 : memref<1x128xf32, #tpu.memory_space<any>>) dst(%arg10 : memref<1x128xf32, #tpu.memory_space<vmem>>)
    %c0_63 = arith.constant 0 : index
    %c0_64 = arith.constant 0 : index
    %266 = vector.load %arg8[%c0_63, %c0_64] : memref<8x128xf32, #tpu.memory_space<vmem>>, vector<8x128xf32>
    %c0_65 = arith.constant 0 : index
    %c0_66 = arith.constant 0 : index
    %267 = vector.load %arg9[%c0_65, %c0_66] : memref<128x128xf32, #tpu.memory_space<vmem>>, vector<128x128xf32>
    %cst_67 = arith.constant dense<0.000000e+00> : vector<8x128xf32>
    %268 = tpu.matmul %266, %267, %cst_67 {dimension_numbers = #tpu.dot_dimension_numbers<[1], [0], [0], [1], [0, 0, 1, 1], [], []>} : vector<8x128xf32>, vector<128x128xf32>, vector<8x128xf32> -> vector<8x128xf32>
    %c0_68 = arith.constant 0 : index
    %c0_69 = arith.constant 0 : index
    %269 = vector.load %arg10[%c0_68, %c0_69] : memref<1x128xf32, #tpu.memory_space<vmem>>, vector<1x128xf32>
    %270 = vector.broadcast %269 : vector<1x128xf32> to vector<8x128xf32>
    %271 = arith.addf %268, %270 : vector<8x128xf32>
    %cst_70 = arith.constant dense<0xFF800000> : vector<8xf32>
    %272 = vector.multi_reduction <maximumf>, %271, %cst_70 [1] : vector<8x128xf32> to vector<8xf32>
    %273 = vector.shape_cast %272 : vector<8xf32> to vector<8x1xf32>
    %274 = vector.broadcast %273 : vector<8x1xf32> to vector<8x128xf32>
    %275 = arith.subf %271, %274 : vector<8x128xf32>
    %276 = math.exp %275 : vector<8x128xf32>
    %cst_71 = arith.constant dense<0.000000e+00> : vector<8xf32>
    %277 = vector.multi_reduction <add>, %276, %cst_71 [1] : vector<8x128xf32> to vector<8xf32>
    %278 = vector.shape_cast %277 : vector<8xf32> to vector<8x1xf32>
    %279 = tpu.reciprocal %278 {approx = true} : vector<8x1xf32> -> vector<8x1xf32>
    %280 = arith.mulf %278, %279 : vector<8x1xf32>
    %cst_72 = arith.constant 2.000000e+00 : f32
    %281 = vector.broadcast %cst_72 : f32 to vector<8x1xf32>
    %282 = arith.subf %281, %280 : vector<8x1xf32>
    %283 = arith.mulf %279, %282 : vector<8x1xf32>
    %284 = vector.broadcast %283 : vector<8x1xf32> to vector<8x128xf32>
    %285 = arith.mulf %276, %284 : vector<8x128xf32>
    %c0_73 = arith.constant 0 : index
    %c0_74 = arith.constant 0 : index
    %286 = vector.load %arg6[%c0_73, %c0_74] : memref<8x128xf32, #tpu.memory_space<vmem>>, vector<8x128xf32>
    tpu.vector_store %arg6[%c0_73, %c0_74], %285 {strides = array<i32>} : memref<8x128xf32, #tpu.memory_space<vmem>>, vector<8x128xf32>,
    return
  }
}

</mosaic_0001>

<bundles_post_ra>
// kernel: lstm_tagger_forward.1
= control target key start
LH: loop header
LB: loop body
LE: loop exit
PB: predicated region body
PF: predicated region fallthrough
CT: control target
= control target key end

     0   :  { %11 = vsyncpa [#allocation8], 0  ;;  %s3657_s0 = inlined_call_operand.vmem [shape: f32[8,128], index: 0, kind: input, shape index: {}]   ;;  %s3658_s1 = inlined_call_operand.hbm [shape: f32[128,512], index: 1, kind: input, shape index: {}]   ;;  %s3659_s2 = inlined_call_operand.hbm [shape: f32[128,512], index: 2, kind: input, shape index: {}]   ;;  %s3660_s3 = inlined_call_operand.hbm [shape: f32[1,512], index: 3, kind: input, shape index: {}]   ;;  %s3661_s4 = inlined_call_operand.hbm [shape: f32[128,128], index: 4, kind: input, shape index: {}]   ;;  %s3662_s5 = inlined_call_operand.hbm [shape: f32[1,128], index: 5, kind: input, shape index: {}]   ;;  %s3663_s6 = inlined_call_operand.hbm [shape: f32[8,128], index: 6, kind: output, shape index: {}]  }
   0x1   :  { %12 = vsyncpa [#allocation11], 0 }
   0x2   :  { %13 = vsyncpa [#allocation9], 0  ;;  %s3133_s21 = smov [#allocation10]   ;;  %s3134_s23 = smov [#allocation7]  }
   0x3   :  { %s33_s22 = sshll.u32 %s3133_s21, 4  ;;  %s21_s24 = sshll.u32 %s3134_s23, 4  ;;  %s34_s22 = int_to_ptr.vmem [resolvable:$true] %s33_s22  ;;  %s3180_s24 = int_to_ptr.vmem [resolvable:$true] %s21_s24 }
   0x4   :  { %s2991_s27 = scalar_lea.hbm %s3659_s2, 8192 }
   0x5   :  { %p2992_p0 = scmp.ne.s32.totalorder %s3659_s2, %s2991_s27  ;;  %p2995_p1 = scmp.lt.u32.totalorder %s2991_s27, %s3659_s2 }
   0x7   :  { %p2997_p2 = pnand %p2995_p1, %p2992_p0 }
   0x9   :  { %3000 = shalt.err (!%p2997_p2)
}
   0xa   :  { %s3001_s8 = scalar_lea.vmem %s34_s22, 8192  ;;  %p3006_p4 = scmp.lt.s32.totalorder %s34_s22, %s34_s22 }
   0xb   :  { %p3002_p3 = scmp.ne.s32.totalorder %s34_s22, %s3001_s8  ;;  %p3007_p5 = scmp.lt.s32.totalorder %s3001_s8, %s3001_s8 }
   0xd   :  { %p3008_p6 = por %p3007_p5, %p3006_p4 }
   0xf   :  { %p3009_p7 = pnand %p3008_p6, %p3002_p3 }
  0x11   :  { %3012 = shalt.err (!%p3009_p7)
}
  0x12   :  { %s3135_s9 = smov 512   ;;  %s3136_s10 = smov 32  }
  0x13   :  { %39 = dma.hbm_to_vmem [thread:$0]  %s3659_s2, 8192, %s34_s22, [#allocation11], %s3135_s9, %s3135_s9, %s3136_s10  }
  0x14   :  { %s3013_s15 = scalar_lea.hbm %s3658_s1, 8192 }
  0x15   :  { %p3014_p8 = scmp.ne.s32.totalorder %s3658_s1, %s3013_s15  ;;  %p3017_p9 = scmp.lt.u32.totalorder %s3013_s15, %s3658_s1 }
  0x17   :  { %p3019_p10 = pnand %p3017_p9, %p3014_p8 }
  0x19   :  { %3022 = shalt.err (!%p3019_p10)
}
  0x1a   :  { %s3023_s20 = scalar_lea.vmem %s3180_s24, 8192  ;;  %p3028_p12 = scmp.lt.s32.totalorder %s3180_s24, %s3180_s24 }
  0x1b   :  { %p3024_p11 = scmp.ne.s32.totalorder %s3180_s24, %s3023_s20  ;;  %p3029_p13 = scmp.lt.s32.totalorder %s3023_s20, %s3023_s20 }
  0x1d   :  { %p3030_p0 = por %p3029_p13, %p3028_p12 }
  0x1f   :  { %p3031_p1 = pnand %p3030_p0, %p3024_p11 }
  0x21   :  { %3034 = shalt.err (!%p3031_p1)
}
  0x22   :  { %27 = dma.hbm_to_vmem [thread:$0]  %s3658_s1, 8192, %s3180_s24, [#allocation8], %s3135_s9, %s3135_s9, %s3136_s10  }
  0x23   :  { %s3137_s22 = smov [#allocation12]   ;;  %s3035_s27 = scalar_lea.hbm %s3660_s3, 64 }
  0x24   :  { %s46_s23 = sshll.u32 %s3137_s22, 4  ;;  %p3036_p2 = scmp.ne.s32.totalorder %s3660_s3, %s3035_s27  ;;  %s47_s23 = int_to_ptr.vmem [resolvable:$true] %s46_s23 }
  0x25   :  { %p3039_p3 = scmp.lt.u32.totalorder %s3035_s27, %s3660_s3 }
  0x27   :  { %p3041_p4 = pnand %p3039_p3, %p3036_p2 }
  0x29   :  { %3044 = shalt.err (!%p3041_p4)
}
  0x2a   :  { %s3045_s8 = scalar_lea.vmem %s47_s23, 64  ;;  %p3050_p6 = scmp.lt.s32.totalorder %s47_s23, %s47_s23 }
  0x2b   :  { %p3046_p5 = scmp.ne.s32.totalorder %s47_s23, %s3045_s8  ;;  %p3051_p7 = scmp.lt.s32.totalorder %s3045_s8, %s3045_s8 }
  0x2d   :  { %p3052_p8 = por %p3051_p7, %p3050_p6 }
  0x2f   :  { %p3053_p9 = pnand %p3052_p8, %p3046_p5 }
  0x31   :  { %3056 = shalt.err (!%p3053_p9)
}
  0x32   :  { %49 = dma.hbm_to_vmem [thread:$0]  %s3660_s3, 64, %s47_s23, [#allocation11]  }
  0x33   :  { %3123 = dma.done.wait [#allocation8], 8192  }
  0x34   :  { %3124 = vsyncadd [#allocation8], 4294959104 }
  0x35   :  { %3125 = dma.done.wait [#allocation11], 8256  }
  0x36   :  { %3126 = vsyncadd [#allocation11], 4294959040  ;;  %v3138_v0 = vmov 0.0   ;;  %v84_v1 = vld [vmem:[#allocation7 + $0x8] sm:$0xff]  ;;  %v86_v3 = vld [vmem:[#allocation7 + $0x18] sm:$0xff]  ;;  %s3141_s11 = smov [#allocation5]  }
  0x37   :  { %233 = vmatprep.mubr.f32.mxu0 %v3138_v0  ;;  %304 = vmatprep.mubr.f32.mxu1 %v3138_v0  ;;  %v88_v2 = vld [vmem:[#allocation7 + $0x28] sm:$0xff]  ;;  %v90_v5 = vld [vmem:[#allocation7 + $0x38] sm:$0xff]  ;;  %v83_v6 = vld [vmem:[#allocation7] sm:$0xff]  ;;  %s78_s12 = sshll.u32 %s3141_s11, 4  ;;  %s3057_s15 = scalar_lea.hbm %s3661_s4, 2048  ;;  %s79_s12 = int_to_ptr.vmem [resolvable:$true] %s78_s12 }
  0x38   :  { %v2247_v4 = vpack.c.bf16 %v88_v2, %v84_v1  ;;  %v87_v7 = vld [vmem:[#allocation7 + $0x20] sm:$0xff]  ;;  %v2279_v8 = vpack.c.bf16 %v90_v5, %v86_v3  ;;  %v85_v10 = vld [vmem:[#allocation7 + $0x10] sm:$0xff]  ;;  %v92_v12 = vld [vmem:[#allocation7 + $0x48] sm:$0xff]  ;;  %p3058_p10 = scmp.ne.s32.totalorder %s3661_s4, %s3057_s15  ;;  %p3061_p11 = scmp.lt.u32.totalorder %s3057_s15, %s3661_s4 }
  0x39   :  { %v2249_v9 = vpack.c.bf16 %v87_v7, %v83_v6  ;;  %v89_v11 = vld [vmem:[#allocation7 + $0x30] sm:$0xff]  ;;  %v96_v14 = vld [vmem:[#allocation7 + $0x68] sm:$0xff]  ;;  %v94_v15 = vld [vmem:[#allocation7 + $0x58] sm:$0xff] }
  0x3a   :  { %2248 = vmatprep.subr.bf16.mxu0 %v2247_v4  ;;  %v2281_v13 = vpack.c.bf16 %v89_v11, %v85_v10  ;;  %v98_v16 = vld [vmem:[#allocation7 + $0x78] sm:$0xff]  ;;  %2280 = vmatprep.subr.bf16.mxu1 %v2279_v8  ;;  %v2251_v17 = vpack.c.bf16 %v96_v14, %v92_v12  ;;  %v91_v19 = vld [vmem:[#allocation7 + $0x40] sm:$0xff]  ;;  %v93_v21 = vld [vmem:[#allocation7 + $0x50] sm:$0xff]  ;;  %p3063_p12 = pnand %p3061_p11, %p3058_p10 }
  0x3b   :  { %2250 = vmatpush1.bf16.msra.mxu0 %v2249_v9  ;;  %v2283_v18 = vpack.c.bf16 %v98_v16, %v94_v15  ;;  %v95_v20 = vld [vmem:[#allocation7 + $0x60] sm:$0xff]  ;;  %v97_v23 = vld [vmem:[#allocation7 + $0x70] sm:$0xff]  ;;  %v100_v24 = vld [vmem:[#allocation7 + $0x88] sm:$0xff] }
  0x3c   :  { %2282 = vmatpush1.bf16.msra.mxu1 %v2281_v13  ;;  %v2253_v22 = vpack.c.bf16 %v95_v20, %v91_v19  ;;  %v104_v25 = vld [vmem:[#allocation7 + $0xa8] sm:$0xff]  ;;  %2252 = vmatprep.subr.bf16.mxu0 %v2251_v17  ;;  %v2285_v26 = vpack.c.bf16 %v97_v23, %v93_v21  ;;  %v102_v28 = vld [vmem:[#allocation7 + $0x98] sm:$0xff]  ;;  %v99_v30 = vld [vmem:[#allocation7 + $0x80] sm:$0xff] }
  0x3d   :  { %2284 = vmatprep.subr.bf16.mxu1 %v2283_v18  ;;  %v2255_v27 = vpack.c.bf16 %v104_v25, %v100_v24  ;;  %v106_v29 = vld [vmem:[#allocation7 + $0xb8] sm:$0xff]  ;;  %v103_v32 = vld [vmem:[#allocation7 + $0xa0] sm:$0xff]  ;;  %v101_v33 = vld [vmem:[#allocation7 + $0x90] sm:$0xff] }
  0x3e   :  { %v2287_v31 = vpack.c.bf16 %v106_v29, %v102_v28  ;;  %v105_v34 = vld [vmem:[#allocation7 + $0xb0] sm:$0xff]  ;;  %v2257_v35 = vpack.c.bf16 %v103_v32, %v99_v30  ;;  %v108_v36 = vld [vmem:[#allocation7 + $0xc8] sm:$0xff]  ;;  %v110_v38 = vld [vmem:[#allocation7 + $0xd8] sm:$0xff] }
  0x3f   :  { %2254 = vmatpush1.bf16.msra.mxu0 %v2253_v22  ;;  %v112_v37 = vld [vmem:[#allocation7 + $0xe8] sm:$0xff]  ;;  %v2289_v39 = vpack.c.bf16 %v105_v34, %v101_v33  ;;  %v114_v41 = vld [vmem:[#allocation7 + $0xf8] sm:$0xff]  ;;  %v107_v42 = vld [vmem:[#allocation7 + $0xc0] sm:$0xff] }
  0x40   :  { %2286 = vmatpush1.bf16.msra.mxu1 %v2285_v26  ;;  %2256 = vmatprep.subr.bf16.mxu0 %v2255_v27  ;;  %v2259_v40 = vpack.c.bf16 %v112_v37, %v108_v36  ;;  %v111_v43 = vld [vmem:[#allocation7 + $0xe0] sm:$0xff]  ;;  %v2291_v44 = vpack.c.bf16 %v114_v41, %v110_v38  ;;  %v109_v45 = vld [vmem:[#allocation7 + $0xd0] sm:$0xff]  ;;  %v116_v47 = vld [vmem:[#allocation7 + $0x108] sm:$0xff] }
  0x41   :  { %2288 = vmatprep.subr.bf16.mxu1 %v2287_v31  ;;  %v113_v46 = vld [vmem:[#allocation7 + $0xf0] sm:$0xff]  ;;  %v120_v48 = vld [vmem:[#allocation7 + $0x128] sm:$0xff]  ;;  %v118_v49 = vld [vmem:[#allocation7 + $0x118] sm:$0xff]  ;;  %v2261_v51 = vpack.c.bf16 %v111_v43, %v107_v42 }
  0x42   :  { %v122_v50 = vld [vmem:[#allocation7 + $0x138] sm:$0xff]  ;;  %v2293_v52 = vpack.c.bf16 %v113_v46, %v109_v45  ;;  %v2263_v53 = vpack.c.bf16 %v120_v48, %v116_v47  ;;  %v115_v54 = vld [vmem:[#allocation7 + $0x100] sm:$0xff]  ;;  %v117_v56 = vld [vmem:[#allocation7 + $0x110] sm:$0xff] }
  0x43   :  { %2258 = vmatpush1.bf16.msra.mxu0 %v2257_v35  ;;  %v119_v55 = vld [vmem:[#allocation7 + $0x120] sm:$0xff]  ;;  %v2295_v57 = vpack.c.bf16 %v122_v50, %v118_v49  ;;  %v121_v58 = vld [vmem:[#allocation7 + $0x130] sm:$0xff]  ;;  %v124_v59 = vld [vmem:[#allocation7 + $0x148] sm:$0xff] }
  0x44   :  { %2290 = vmatpush1.bf16.msra.mxu1 %v2289_v39  ;;  %2260 = vmatprep.subr.bf16.mxu0 %v2259_v40  ;;  %v128_v60 = vld [vmem:[#allocation7 + $0x168] sm:$0xff]  ;;  %v126_v61 = vld [vmem:[#allocation7 + $0x158] sm:$0xff]  ;;  %v2265_v63 = vpack.c.bf16 %v119_v55, %v115_v54  ;;  %v2297_v1 = vpack.c.bf16 %v121_v58, %v117_v56  ;;  %v123_v3 = vld [vmem:[#allocation7 + $0x140] sm:$0xff] }
  0x45   :  { %2292 = vmatprep.subr.bf16.mxu1 %v2291_v44  ;;  %v130_v62 = vld [vmem:[#allocation7 + $0x178] sm:$0xff]  ;;  %v2267_v2 = vpack.c.bf16 %v128_v60, %v124_v59  ;;  %v127_v4 = vld [vmem:[#allocation7 + $0x160] sm:$0xff]  ;;  %v125_v5 = vld [vmem:[#allocation7 + $0x150] sm:$0xff] }
  0x46   :  { %v2299_v6 = vpack.c.bf16 %v130_v62, %v126_v61  ;;  %v129_v7 = vld [vmem:[#allocation7 + $0x170] sm:$0xff]  ;;  %v132_v8 = vld [vmem:[#allocation7 + $0x188] sm:$0xff]  ;;  %v134_v10 = vld [vmem:[#allocation7 + $0x198] sm:$0xff]  ;;  %v2269_v12 = vpack.c.bf16 %v127_v4, %v123_v3 }
  0x47   :  { %2262 = vmatpush1.bf16.msra.mxu0 %v2261_v51  ;;  %v136_v9 = vld [vmem:[#allocation7 + $0x1a8] sm:$0xff]  ;;  %v138_v11 = vld [vmem:[#allocation7 + $0x1b8] sm:$0xff]  ;;  %v2301_v13 = vpack.c.bf16 %v129_v7, %v125_v5  ;;  %v131_v15 = vld [vmem:[#allocation7 + $0x180] sm:$0xff] }
  0x48   :  { %2294 = vmatpush1.bf16.msra.mxu1 %v2293_v52  ;;  %2264 = vmatprep.subr.bf16.mxu0 %v2263_v53  ;;  %v2271_v14 = vpack.c.bf16 %v136_v9, %v132_v8  ;;  %v135_v16 = vld [vmem:[#allocation7 + $0x1a0] sm:$0xff]  ;;  %v133_v17 = vld [vmem:[#allocation7 + $0x190] sm:$0xff]  ;;  %v2303_v18 = vpack.c.bf16 %v138_v11, %v134_v10  ;;  %v140_v20 = vld [vmem:[#allocation7 + $0x1c8] sm:$0xff] }
  0x49   :  { %2296 = vmatprep.subr.bf16.mxu1 %v2295_v57  ;;  %v137_v19 = vld [vmem:[#allocation7 + $0x1b0] sm:$0xff]  ;;  %v144_v21 = vld [vmem:[#allocation7 + $0x1e8] sm:$0xff]  ;;  %v142_v22 = vld [vmem:[#allocation7 + $0x1d8] sm:$0xff]  ;;  %v2273_v24 = vpack.c.bf16 %v135_v16, %v131_v15 }
  0x4a   :  { %v146_v23 = vld [vmem:[#allocation7 + $0x1f8] sm:$0xff]  ;;  %v2305_v25 = vpack.c.bf16 %v137_v19, %v133_v17  ;;  %v2275_v26 = vpack.c.bf16 %v144_v21, %v140_v20  ;;  %v139_v27 = vld [vmem:[#allocation7 + $0x1c0] sm:$0xff]  ;;  %v141_v29 = vld [vmem:[#allocation7 + $0x1d0] sm:$0xff] }
  0x4b   :  { %2266 = vmatpush1.bf16.msra.mxu0 %v2265_v63  ;;  %v143_v28 = vld [vmem:[#allocation7 + $0x1e0] sm:$0xff]  ;;  %v2307_v30 = vpack.c.bf16 %v146_v23, %v142_v22  ;;  %v145_v31 = vld [vmem:[#allocation7 + $0x1f0] sm:$0xff]  ;;  %v316_v32 = vld [vmem:[#allocation10 + $0x8] sm:$0xff] }
  0x4c   :  { %2298 = vmatpush1.bf16.msra.mxu1 %v2297_v1  ;;  %2268 = vmatprep.subr.bf16.mxu0 %v2267_v2  ;;  %v320_v33 = vld [vmem:[#allocation10 + $0x28] sm:$0xff]  ;;  %v318_v34 = vld [vmem:[#allocation10 + $0x18] sm:$0xff]  ;;  %v2277_v36 = vpack.c.bf16 %v143_v28, %v139_v27  ;;  %v2309_v37 = vpack.c.bf16 %v145_v31, %v141_v29  ;;  %v315_v39 = vld [vmem:[#allocation10] sm:$0xff] }
  0x4d   :  { %2300 = vmatprep.subr.bf16.mxu1 %v2299_v6  ;;  %v322_v35 = vld [vmem:[#allocation10 + $0x38] sm:$0xff]  ;;  %v3225_v38 = vpack.c.bf16 %v320_v33, %v316_v32  ;;  %v319_v40 = vld [vmem:[#allocation10 + $0x20] sm:$0xff]  ;;  %v317_v41 = vld [vmem:[#allocation10 + $0x10] sm:$0xff] }
  0x4e   :  { %v3227_v42 = vpack.c.bf16 %v322_v35, %v318_v34  ;;  %v321_v43 = vld [vmem:[#allocation10 + $0x30] sm:$0xff]  ;;  %v324_v44 = vld [vmem:[#allocation10 + $0x48] sm:$0xff]  ;;  %v326_v46 = vld [vmem:[#allocation10 + $0x58] sm:$0xff]  ;;  %v3232_v49 = vpack.c.bf16 %v319_v40, %v315_v39 }
  0x4f   :  { %2270 = vmatpush1.bf16.msra.mxu0 %v2269_v12  ;;  %v328_v45 = vld [vmem:[#allocation10 + $0x68] sm:$0xff]  ;;  %v330_v47 = vld [vmem:[#allocation10 + $0x78] sm:$0xff]  ;;  %v3235_v50 = vpack.c.bf16 %v321_v43, %v317_v41  ;;  %v323_v52 = vld [vmem:[#allocation10 + $0x40] sm:$0xff] }
  0x50   :  { %2302 = vmatpush1.bf16.msra.mxu1 %v2301_v13  ;;  %2272 = vmatprep.subr.bf16.mxu0 %v2271_v14  ;;  %v82_v48 = vld [vmem:[%s3657_s0] sm:$0xff]  ;;  %v3237_v51 = vpack.c.bf16 %v328_v45, %v324_v44  ;;  %v327_v53 = vld [vmem:[#allocation10 + $0x60] sm:$0xff]  ;;  %v3240_v55 = vpack.c.bf16 %v330_v47, %v326_v46  ;;  %v332_v57 = vld [vmem:[#allocation10 + $0x88] sm:$0xff]  ;;  %s3140_s0 = smov [#allocation4]  }
  0x51   :  { %2304 = vmatprep.subr.bf16.mxu1 %v2303_v18  ;;  %v325_v54 = vld [vmem:[#allocation10 + $0x50] sm:$0xff]  ;;  %v336_v58 = vld [vmem:[#allocation10 + $0xa8] sm:$0xff]  ;;  %v334_v59 = vld [vmem:[#allocation10 + $0x98] sm:$0xff]  ;;  %v3243_v61 = vpack.c.bf16 %v327_v53, %v323_v52  ;;  %s66_s10 = sshll.u32 %s3140_s0, 4  ;;  %s67_s10 = int_to_ptr.vmem [resolvable:$true] %s66_s10 }
  0x52   :  { %v329_v56 = vld [vmem:[#allocation10 + $0x70] sm:$0xff]  ;;  %v338_v60 = vld [vmem:[#allocation10 + $0xb8] sm:$0xff]  ;;  %v3249_v63 = vpack.c.bf16 %v336_v58, %v332_v57  ;;  %v331_v1 = vld [vmem:[#allocation10 + $0x80] sm:$0xff] }
  0x53   :  { %2274 = vmatpush1.bf16.msra.mxu0 %v2273_v24  ;;  %v3247_v62 = vpack.c.bf16 %v329_v56, %v325_v54  ;;  %v335_v2 = vld [vmem:[#allocation10 + $0xa0] sm:$0xff]  ;;  %v333_v3 = vld [vmem:[#allocation10 + $0x90] sm:$0xff]  ;;  %v3252_v4 = vpack.c.bf16 %v338_v60, %v334_v59  ;;  %v340_v6 = vld [vmem:[#allocation10 + $0xc8] sm:$0xff] }
  0x54   :  { %2306 = vmatpush1.bf16.msra.mxu1 %v2305_v25  ;;  %2276 = vmatprep.subr.bf16.mxu0 %v2275_v26  ;;  %v337_v5 = vld [vmem:[#allocation10 + $0xb0] sm:$0xff]  ;;  %v344_v7 = vld [vmem:[#allocation10 + $0xe8] sm:$0xff]  ;;  %v342_v8 = vld [vmem:[#allocation10 + $0xd8] sm:$0xff]  ;;  %v3257_v10 = vpack.c.bf16 %v335_v2, %v331_v1 }
  0x55   :  { %2308 = vmatprep.subr.bf16.mxu1 %v2307_v30  ;;  %v346_v9 = vld [vmem:[#allocation10 + $0xf8] sm:$0xff]  ;;  %v3261_v11 = vpack.c.bf16 %v337_v5, %v333_v3  ;;  %v3263_v12 = vpack.c.bf16 %v344_v7, %v340_v6  ;;  %v339_v13 = vld [vmem:[#allocation10 + $0xc0] sm:$0xff]  ;;  %v341_v15 = vld [vmem:[#allocation10 + $0xd0] sm:$0xff] }
  0x56   :  { %v343_v14 = vld [vmem:[#allocation10 + $0xe0] sm:$0xff]  ;;  %v3266_v16 = vpack.c.bf16 %v346_v9, %v342_v8  ;;  %v345_v17 = vld [vmem:[#allocation10 + $0xf0] sm:$0xff]  ;;  %v348_v18 = vld [vmem:[#allocation10 + $0x108] sm:$0xff] }
  0x57   :  { %2278 = vmatpush1.bf16.msra.mxu0 %v2277_v36  ;;  %v352_v19 = vld [vmem:[#allocation10 + $0x128] sm:$0xff]  ;;  %v350_v20 = vld [vmem:[#allocation10 + $0x118] sm:$0xff]  ;;  %v3269_v22 = vpack.c.bf16 %v343_v14, %v339_v13  ;;  %v3273_v23 = vpack.c.bf16 %v345_v17, %v341_v15  ;;  %v347_v25 = vld [vmem:[#allocation10 + $0x100] sm:$0xff] }
  0x58   :  { %2310 = vmatpush1.bf16.msra.mxu1 %v2309_v37  ;;  %2312 = vmatprep.subr.bf16.mxu0 %v3225_v38  ;;  %v354_v21 = vld [vmem:[#allocation10 + $0x138] sm:$0xff]  ;;  %v3275_v24 = vpack.c.bf16 %v352_v19, %v348_v18  ;;  %v351_v26 = vld [vmem:[#allocation10 + $0x120] sm:$0xff]  ;;  %v349_v27 = vld [vmem:[#allocation10 + $0x110] sm:$0xff]  ;;  %v149_v19 = vlaneseq }
  0x59   :  { %2344 = vmatprep.subr.bf16.mxu1 %v3227_v42  ;;  %v3278_v28 = vpack.c.bf16 %v354_v21, %v350_v20  ;;  %v353_v29 = vld [vmem:[#allocation10 + $0x130] sm:$0xff]  ;;  %v356_v30 = vld [vmem:[#allocation10 + $0x148] sm:$0xff]  ;;  %v358_v32 = vld [vmem:[#allocation10 + $0x158] sm:$0xff]  ;;  %v3281_v34 = vpack.c.bf16 %v351_v26, %v347_v25 }
  0x5a   :  { %234 = vmatmul.mubr.f32.vlgmr.msra.gmra.mrb[0].mxu0 %v82_v48  ;;  %v360_v31 = vld [vmem:[#allocation10 + $0x168] sm:$0xff]  ;;  %v362_v33 = vld [vmem:[#allocation10 + $0x178] sm:$0xff]  ;;  %v3285_v35 = vpack.c.bf16 %v353_v29, %v349_v27  ;;  %v355_v37 = vld [vmem:[#allocation10 + $0x140] sm:$0xff]  ;;  %v150_v20 = vshrl.u32 %v149_v19, 7 }
  0x5b   :  { %305 = vmatmul.mubr.f32.vlgmr.msra.gmra.mrb[0].mxu1 %v82_v48  ;;  %2314 = vmatpush1.bf16.msra.mxu0 %v3232_v49  ;;  %v3287_v36 = vpack.c.bf16 %v360_v31, %v356_v30  ;;  %v359_v39 = vld [vmem:[#allocation10 + $0x160] sm:$0xff]  ;;  %v357_v40 = vld [vmem:[#allocation10 + $0x150] sm:$0xff]  ;;  %v3290_v41 = vpack.c.bf16 %v362_v33, %v358_v32  ;;  %v364_v44 = vld [vmem:[#allocation10 + $0x188] sm:$0xff] }
  0x5c   :  { %2346 = vmatpush1.bf16.msra.mxu1 %v3235_v50  ;;  %2316 = vmatprep.subr.bf16.mxu0 %v3237_v51  ;;  %v361_v43 = vld [vmem:[#allocation10 + $0x170] sm:$0xff]  ;;  %v368_v45 = vld [vmem:[#allocation10 + $0x1a8] sm:$0xff]  ;;  %v366_v46 = vld [vmem:[#allocation10 + $0x198] sm:$0xff]  ;;  %v3293_v48 = vpack.c.bf16 %v359_v39, %v355_v37  ;;  %v151_v21 = vsub.s32 0, %v150_v20  ;;  %v159_v26 = vsub.s32 2, %v150_v20  ;;  %v155_v27 = vsub.s32 1, %v150_v20 }
  0x5d   :  { %2348 = vmatprep.subr.bf16.mxu1 %v3240_v55  ;;  %444 = vmatprep.mubr.f32.mxu0 %v3138_v0  ;;  %v370_v47 = vld [vmem:[#allocation10 + $0x1b8] sm:$0xff]  ;;  %v3297_v52 = vpack.c.bf16 %v361_v43, %v357_v40  ;;  %v3299_v53 = vpack.c.bf16 %v368_v45, %v364_v44  ;;  %v363_v54 = vld [vmem:[#allocation10 + $0x180] sm:$0xff]  ;;  %v365_v57 = vld [vmem:[#allocation10 + $0x190] sm:$0xff]  ;;  %v163_v29 = vsub.s32 3, %v150_v20 }
  0x5e   :  { %515 = vmatprep.mubr.f32.mxu1 %v3138_v0  ;;  %v367_v56 = vld [vmem:[#allocation10 + $0x1a0] sm:$0xff]  ;;  %v3302_v58 = vpack.c.bf16 %v370_v47, %v366_v46  ;;  %v369_v59 = vld [vmem:[#allocation10 + $0x1b0] sm:$0xff]  ;;  %v372_v60 = vld [vmem:[#allocation10 + $0x1c8] sm:$0xff] }
  0x5f   :  { %2318 = vmatpush1.bf16.msra.mxu0 %v3243_v61  ;;  %v376_v1 = vld [vmem:[#allocation10 + $0x1e8] sm:$0xff]  ;;  %v374_v2 = vld [vmem:[#allocation10 + $0x1d8] sm:$0xff]  ;;  %v3305_v5 = vpack.c.bf16 %v367_v56, %v363_v54  ;;  %v3309_v6 = vpack.c.bf16 %v369_v59, %v365_v57  ;;  %v371_v8 = vld [vmem:[#allocation10 + $0x1c0] sm:$0xff]  ;;  %v3139_v54 = vmov 1966171168  }
  0x60   :  { %2350 = vmatpush1.bf16.msra.mxu1 %v3247_v62  ;;  %2320 = vmatprep.subr.bf16.mxu0 %v3249_v63  ;;  %v378_v3 = vld [vmem:[#allocation10 + $0x1f8] sm:$0xff]  ;;  %v3311_v7 = vpack.c.bf16 %v376_v1, %v372_v60  ;;  %v375_v9 = vld [vmem:[#allocation10 + $0x1e0] sm:$0xff]  ;;  %v373_v14 = vld [vmem:[#allocation10 + $0x1d0] sm:$0xff]  ;;  %v529_v56 = vunpack.c.l.s4 %v3139_v54 }
  0x61   :  { %2352 = vmatprep.subr.bf16.mxu1 %v3252_v4  ;;  %v3314_v13 = vpack.c.bf16 %v378_v3, %v374_v2  ;;  %v377_v15 = vld [vmem:[#allocation10 + $0x1f0] sm:$0xff]  ;;  %v3317_v17 = vpack.c.bf16 %v375_v9, %v371_v8  ;;  %v147_v25 = vld [vmem:[#allocation12] sm:$0xf] }
  0x62   :  { %v3321_v18 = vpack.c.bf16 %v377_v15, %v373_v14  ;;  %v152_v30 = vrot.slane %v147_v25, %v151_v21  ;;  %v160_v31 = vrot.slane %v147_v25, %v159_v26  ;;  %v156_v32 = vrot.slane %v147_v25, %v155_v27 }
  0x63   :  { %2322 = vmatpush1.bf16.msra.mxu0 %v3257_v10  ;;  %v164_v33 = vrot.slane %v147_v25, %v163_v29  ;;  %v530_v57 = vunpack.c.0.s8 %v529_v56 }
  0x64   :  { %2354 = vmatpush1.bf16.msra.mxu1 %v3261_v11  ;;  %2324 = vmatprep.subr.bf16.mxu0 %v3263_v12 }
  0x65   :  { %2356 = vmatprep.subr.bf16.mxu1 %v3266_v16  ;;  %v3364_v59 = vsub.s32 %v530_v57, %v150_v20 }
  0x67   :  { %2326 = vmatpush1.bf16.msra.mxu0 %v3269_v22 }
  0x68   :  { %2358 = vmatpush1.bf16.msra.mxu1 %v3273_v23  ;;  %2328 = vmatprep.subr.bf16.mxu0 %v3275_v24 }
  0x69   :  { %2360 = vmatprep.subr.bf16.mxu1 %v3278_v28 }
  0x6b   :  { %2330 = vmatpush1.bf16.msra.mxu0 %v3281_v34 }
  0x6c   :  { %2362 = vmatpush1.bf16.msra.mxu1 %v3285_v35  ;;  %2332 = vmatprep.subr.bf16.mxu0 %v3287_v36 }
  0x6d   :  { %2364 = vmatprep.subr.bf16.mxu1 %v3290_v41 }
  0x6f   :  { %2334 = vmatpush1.bf16.msra.mxu0 %v3293_v48 }
  0x70   :  { %2366 = vmatpush1.bf16.msra.mxu1 %v3297_v52  ;;  %2336 = vmatprep.subr.bf16.mxu0 %v3299_v53 }
  0x71   :  { %2368 = vmatprep.subr.bf16.mxu1 %v3302_v58 }
  0x73   :  { %2338 = vmatpush1.bf16.msra.mxu0 %v3305_v5 }
  0x74   :  { %2370 = vmatpush1.bf16.msra.mxu1 %v3309_v6  ;;  %2340 = vmatprep.subr.bf16.mxu0 %v3311_v7 }
  0x75   :  { %2372 = vmatprep.subr.bf16.mxu1 %v3314_v13 }
  0x77   :  { %2342 = vmatpush1.bf16.msra.mxu0 %v3317_v17 }
  0x78   :  { %2374 = vmatpush1.bf16.msra.mxu1 %v3321_v18  ;;  %2376 = vmatprep.subr.bf16.mxu0 %v3225_v38 }
  0x79   :  { %2408 = vmatprep.subr.bf16.mxu1 %v3227_v42 }
  0x7a   :  { %445 = vmatmul.mubr.f32.vlgmr.msra.gmra.mrb[2].mxu0 %v3138_v0 }
  0x7b   :  { %516 = vmatmul.mubr.f32.vlgmr.msra.gmra.mrb[2].mxu1 %v3138_v0  ;;  %2378 = vmatpush1.bf16.msra.mxu0 %v3232_v49 }
  0x7c   :  { %2410 = vmatpush1.bf16.msra.mxu1 %v3235_v50  ;;  %2380 = vmatprep.subr.bf16.mxu0 %v3237_v51 }
  0x7d   :  { %2412 = vmatprep.subr.bf16.mxu1 %v3240_v55  ;;  %650 = vmatprep.mubr.f32.mxu0 %v3138_v0 }
  0x7e   :  { %721 = vmatprep.mubr.f32.mxu1 %v3138_v0 }
  0x7f   :  { %2382 = vmatpush1.bf16.msra.mxu0 %v3243_v61 }
  0x80   :  { %2414 = vmatpush1.bf16.msra.mxu1 %v3247_v62  ;;  %2384 = vmatprep.subr.bf16.mxu0 %v3249_v63 }
  0x81   :  { %2416 = vmatprep.subr.bf16.mxu1 %v3252_v4 }
  0x83   :  { %2386 = vmatpush1.bf16.msra.mxu0 %v3257_v10 }
  0x84   :  { %2418 = vmatpush1.bf16.msra.mxu1 %v3261_v11  ;;  %2388 = vmatprep.subr.bf16.mxu0 %v3263_v12 }
  0x85   :  { %2420 = vmatprep.subr.bf16.mxu1 %v3266_v16 }
  0x87   :  { %2390 = vmatpush1.bf16.msra.mxu0 %v3269_v22 }
  0x88   :  { %2422 = vmatpush1.bf16.msra.mxu1 %v3273_v23  ;;  %2392 = vmatprep.subr.bf16.mxu0 %v3275_v24 }
  0x89   :  { %2424 = vmatprep.subr.bf16.mxu1 %v3278_v28 }
  0x8b   :  { %2394 = vmatpush1.bf16.msra.mxu0 %v3281_v34 }
  0x8c   :  { %2426 = vmatpush1.bf16.msra.mxu1 %v3285_v35  ;;  %2396 = vmatprep.subr.bf16.mxu0 %v3287_v36 }
  0x8d   :  { %2428 = vmatprep.subr.bf16.mxu1 %v3290_v41 }
  0x8f   :  { %2398 = vmatpush1.bf16.msra.mxu0 %v3293_v48 }
  0x90   :  { %2430 = vmatpush1.bf16.msra.mxu1 %v3297_v52  ;;  %2400 = vmatprep.subr.bf16.mxu0 %v3299_v53 }
  0x91   :  { %2432 = vmatprep.subr.bf16.mxu1 %v3302_v58 }
  0x93   :  { %2402 = vmatpush1.bf16.msra.mxu0 %v3305_v5 }
  0x94   :  { %2434 = vmatpush1.bf16.msra.mxu1 %v3309_v6  ;;  %2404 = vmatprep.subr.bf16.mxu0 %v3311_v7 }
  0x95   :  { %2436 = vmatprep.subr.bf16.mxu1 %v3314_v13 }
  0x97   :  { %2406 = vmatpush1.bf16.msra.mxu0 %v3317_v17 }
  0x98   :  { %2438 = vmatpush1.bf16.msra.mxu1 %v3321_v18  ;;  %2440 = vmatprep.subr.bf16.mxu0 %v3225_v38 }
  0x99   :  { %2472 = vmatprep.subr.bf16.mxu1 %v3227_v42 }
 0x12d   :  { %v235_v37 = vpop.f32.mrb[0].mxu0 }
 0x12e   :  { %v236_v39 = vadd.f32 %v235_v37, %v152_v30  ;;  %v306_v40 = vpop.f32.mrb[0].mxu1  ;;  %v237_v43 = vpop.f32.mrb[1].mxu0 }
 0x12f   :  { %v307_v44 = vadd.f32 %v306_v40, %v160_v31  ;;  %v238_v45 = vadd.f32 %v237_v43, %v156_v32  ;;  %v308_v46 = vpop.f32.mrb[1].mxu1 }
 0x130   :  { %311 = vst [vmem:[#allocation2] sm:$0xff] %v236_v39  ;;  %v309_v47 = vadd.f32 %v308_v46, %v164_v33 }
 0x131   :  { %313 = vst [vmem:[#allocation2 + $0x10] sm:$0xff] %v307_v44  ;;  %312 = vst [vmem:[#allocation2 + $0x8] sm:$0xff] %v238_v45 }
 0x132   :  { %314 = vst [vmem:[#allocation2 + $0x18] sm:$0xff] %v309_v47 }
 0x139   :  { %v379_v25 = vld [vmem:[#allocation2] ss:$8 sm:$0xf] }
 0x14d   :  { %v446_v60 = vpop.f32.mrb[2].mxu0 }
 0x14e   :  { %v517_v1 = vpop.f32.mrb[2].mxu1  ;;  %v448_v2 = vpop.f32.mrb[3].mxu0 }
 0x14f   :  { %v526_v3 = vcombine.low %v446_v60, %v448_v2  ;;  %v519_v8 = vpop.f32.mrb[3].mxu1 }
 0x150   :  { %v527_v9 = vcombine.low %v517_v1, %v519_v8 }
 0x151   :  { %v534_v14 = vrot.slane %v526_v3, %v3364_v59 }
 0x152   :  { %v541_v15 = vrot.slane %v527_v9, %v3364_v59 }
 0x154   :  { %v542_v19 = vcombine.low %v534_v14, %v541_v15 }
 0x156   :  { %v549_v21 = vrot.slane %v542_v19, %v3364_v59 }
 0x158   :  { %v551_v26 = vadd.f32 %v549_v21, %v379_v25 }
 0x15a   :  { %v2168_v27 = vmul.f32 -1.442695, %v551_v26  ;;  %v559_v29 = vrot.slane %v551_v26, 1  ;;  %v570_v30 = vrot.slane %v551_v26, 3  ;;  %v567_v33 = vrot.slane %v551_v26, 2 }
 0x15c   :  { %2859 = vpow2.f32 %v2168_v27  ;;  %v2169_v20 = vmul.f32 -1.442695, %v559_v29  ;;  %v2170_v31 = vmul.f32 -1.442695, %v570_v30 }
 0x15d   :  { %v585_v29 = vld [vmem:[#allocation2 + $0x1] ss:$8 sm:$0xf] }
 0x15e   :  { %2861 = vpow2.f32 %v2169_v20 }
 0x15f   :  { %2863 = vpow2.f32 %v2170_v31 }
 0x166   :  { %v2860_v32 = vpop.eup %2859 }
 0x167   :  { %v555_v37 = vadd.f32 1.0, %v2860_v32 }
 0x168   :  { %v2862_v39 = vpop.eup %2861 }
 0x169   :  { %2865 = vrcp.f32 %v555_v37  ;;  %v564_v40 = vadd.f32 1.0, %v2862_v39  ;;  %v2864_v43 = vpop.eup %2863 }
 0x16a   :  { %2867 = vtanh.f32 %v567_v33  ;;  %v575_v47 = vadd.f32 1.0, %v2864_v43 }
 0x16b   :  { %2869 = vrcp.f32 %v564_v40 }
 0x16c   :  { %2871 = vrcp.f32 %v575_v47 }
 0x173   :  { %v2866_v44 = vpop.eup %2865 }
 0x174   :  { %v2868_v45 = vpop.eup %2867 }
 0x175   :  { %v2870_v46 = vpop.eup %2869  ;;  %v579_v56 = vmul.f32 %v2868_v45, %v2866_v44 }
 0x176   :  { %v578_v54 = vmul.f32 0.0, %v2870_v46  ;;  %v2872_v60 = vpop.eup %2871 }
 0x178   :  { %v3369_v57 = vadd.f32 %v579_v56, %v578_v54 }
 0x17a   :  { %2873 = vtanh.f32 %v3369_v57 }
 0x184   :  { %v2874_v1 = vpop.eup %2873 }
 0x185   :  { %v582_v2 = vmul.f32 %v2874_v1, %v2872_v60 }
 0x187   :  { %583 = vst [vmem:[#allocation3] sm:$0x1] %v582_v2  ;;  %651 = vmatmul.mubr.f32.vlgmr.msra.gmra.mrb[4].mxu0 %v582_v2  ;;  %722 = vmatmul.mubr.f32.vlgmr.msra.gmra.mrb[4].mxu1 %v582_v2 }
 0x188   :  { %2442 = vmatpush1.bf16.msra.mxu0 %v3232_v49  ;;  %2474 = vmatpush1.bf16.msra.mxu1 %v3235_v50 }
 0x189   :  { %2444 = vmatprep.subr.bf16.mxu0 %v3237_v51  ;;  %2476 = vmatprep.subr.bf16.mxu1 %v3240_v55 }
 0x18a   :  { %856 = vmatprep.mubr.f32.mxu0 %v3138_v0  ;;  %927 = vmatprep.mubr.f32.mxu1 %v3138_v0 }
 0x18c   :  { %2446 = vmatpush1.bf16.msra.mxu0 %v3243_v61  ;;  %2478 = vmatpush1.bf16.msra.mxu1 %v3247_v62 }
 0x18d   :  { %2448 = vmatprep.subr.bf16.mxu0 %v3249_v63  ;;  %2480 = vmatprep.subr.bf16.mxu1 %v3252_v4 }
 0x190   :  { %2450 = vmatpush1.bf16.msra.mxu0 %v3257_v10  ;;  %2482 = vmatpush1.bf16.msra.mxu1 %v3261_v11 }
 0x191   :  { %2452 = vmatprep.subr.bf16.mxu0 %v3263_v12  ;;  %2484 = vmatprep.subr.bf16.mxu1 %v3266_v16 }
 0x194   :  { %2454 = vmatpush1.bf16.msra.mxu0 %v3269_v22  ;;  %2486 = vmatpush1.bf16.msra.mxu1 %v3273_v23 }
 0x195   :  { %2456 = vmatprep.subr.bf16.mxu0 %v3275_v24  ;;  %2488 = vmatprep.subr.bf16.mxu1 %v3278_v28 }
 0x198   :  { %2458 = vmatpush1.bf16.msra.mxu0 %v3281_v34  ;;  %2490 = vmatpush1.bf16.msra.mxu1 %v3285_v35 }
 0x199   :  { %2460 = vmatprep.subr.bf16.mxu0 %v3287_v36  ;;  %2492 = vmatprep.subr.bf16.mxu1 %v3290_v41 }
 0x19c   :  { %2462 = vmatpush1.bf16.msra.mxu0 %v3293_v48  ;;  %2494 = vmatpush1.bf16.msra.mxu1 %v3297_v52 }
 0x19d   :  { %2464 = vmatprep.subr.bf16.mxu0 %v3299_v53  ;;  %2496 = vmatprep.subr.bf16.mxu1 %v3302_v58 }
 0x1a0   :  { %2466 = vmatpush1.bf16.msra.mxu0 %v3305_v5  ;;  %2498 = vmatpush1.bf16.msra.mxu1 %v3309_v6 }
 0x1a1   :  { %2468 = vmatprep.subr.bf16.mxu0 %v3311_v7  ;;  %2500 = vmatprep.subr.bf16.mxu1 %v3314_v13 }
 0x1a4   :  { %2470 = vmatpush1.bf16.msra.mxu0 %v3317_v17  ;;  %2502 = vmatpush1.bf16.msra.mxu1 %v3321_v18 }
 0x1a5   :  { %2504 = vmatprep.subr.bf16.mxu0 %v3225_v38  ;;  %2536 = vmatprep.subr.bf16.mxu1 %v3227_v42 }
 0x25a   :  { %v652_v3 = vpop.f32.mrb[4].mxu0  ;;  %v723_v8 = vpop.f32.mrb[4].mxu1 }
 0x25b   :  { %v654_v9 = vpop.f32.mrb[5].mxu0  ;;  %v725_v14 = vpop.f32.mrb[5].mxu1 }
 0x25c   :  { %v732_v15 = vcombine.low %v652_v3, %v654_v9  ;;  %v733_v19 = vcombine.low %v723_v8, %v725_v14 }
 0x25e   :  { %v740_v21 = vrot.slane %v732_v15, %v3364_v59  ;;  %v747_v25 = vrot.slane %v733_v19, %v3364_v59 }
 0x260   :  { %v748_v26 = vcombine.low %v740_v21, %v747_v25 }
 0x262   :  { %v755_v27 = vrot.slane %v748_v26, %v3364_v59 }
 0x264   :  { %v757_v20 = vadd.f32 %v755_v27, %v585_v29 }
 0x266   :  { %v2171_v30 = vmul.f32 -1.442695, %v757_v20  ;;  %v765_v31 = vrot.slane %v757_v20, 1  ;;  %v776_v33 = vrot.slane %v757_v20, 3  ;;  %v773_v40 = vrot.slane %v757_v20, 2 }
 0x268   :  { %2875 = vpow2.f32 %v2171_v30  ;;  %v2172_v32 = vmul.f32 -1.442695, %v765_v31  ;;  %v2173_v37 = vmul.f32 -1.442695, %v776_v33 }
 0x269   :  { %v791_v31 = vld [vmem:[#allocation2 + $0x2] ss:$8 sm:$0xf] }
 0x26a   :  { %2877 = vpow2.f32 %v2172_v32 }
 0x26b   :  { %2879 = vpow2.f32 %v2173_v37 }
 0x272   :  { %v2876_v39 = vpop.eup %2875 }
 0x273   :  { %v761_v43 = vadd.f32 1.0, %v2876_v39 }
 0x274   :  { %v2878_v44 = vpop.eup %2877 }
 0x275   :  { %2881 = vrcp.f32 %v761_v43  ;;  %v770_v45 = vadd.f32 1.0, %v2878_v44  ;;  %v2880_v46 = vpop.eup %2879 }
 0x276   :  { %2883 = vtanh.f32 %v773_v40  ;;  %v781_v60 = vadd.f32 1.0, %v2880_v46 }
 0x277   :  { %2885 = vrcp.f32 %v770_v45 }
 0x278   :  { %2887 = vrcp.f32 %v781_v60 }
 0x27f   :  { %v2882_v47 = vpop.eup %2881 }
 0x280   :  { %v2884_v54 = vpop.eup %2883 }
 0x281   :  { %v2886_v56 = vpop.eup %2885  ;;  %v785_v2 = vmul.f32 %v2884_v54, %v2882_v47 }
 0x282   :  { %v784_v1 = vmul.f32 %v2886_v56, %v3369_v57  ;;  %v2888_v8 = vpop.eup %2887 }
 0x284   :  { %v3410_v3 = vadd.f32 %v785_v2, %v784_v1 }
 0x286   :  { %2889 = vtanh.f32 %v3410_v3 }
 0x290   :  { %v2890_v9 = vpop.eup %2889 }
 0x291   :  { %v788_v14 = vmul.f32 %v2890_v9, %v2888_v8 }
 0x293   :  { %789 = vst [vmem:[#allocation3 + $0x1] sm:$0x1] %v788_v14  ;;  %857 = vmatmul.mubr.f32.vlgmr.msra.gmra.mrb[6].mxu0 %v788_v14  ;;  %928 = vmatmul.mubr.f32.vlgmr.msra.gmra.mrb[6].mxu1 %v788_v14 }
 0x294   :  { %2506 = vmatpush1.bf16.msra.mxu0 %v3232_v49  ;;  %2538 = vmatpush1.bf16.msra.mxu1 %v3235_v50 }
 0x295   :  { %2508 = vmatprep.subr.bf16.mxu0 %v3237_v51  ;;  %2540 = vmatprep.subr.bf16.mxu1 %v3240_v55 }
 0x296   :  { %1062 = vmatprep.mubr.f32.mxu0 %v3138_v0  ;;  %1133 = vmatprep.mubr.f32.mxu1 %v3138_v0 }
 0x298   :  { %2510 = vmatpush1.bf16.msra.mxu0 %v3243_v61  ;;  %2542 = vmatpush1.bf16.msra.mxu1 %v3247_v62 }
 0x299   :  { %2512 = vmatprep.subr.bf16.mxu0 %v3249_v63  ;;  %2544 = vmatprep.subr.bf16.mxu1 %v3252_v4 }
 0x29c   :  { %2514 = vmatpush1.bf16.msra.mxu0 %v3257_v10  ;;  %2546 = vmatpush1.bf16.msra.mxu1 %v3261_v11 }
 0x29d   :  { %2516 = vmatprep.subr.bf16.mxu0 %v3263_v12  ;;  %2548 = vmatprep.subr.bf16.mxu1 %v3266_v16 }
 0x2a0   :  { %2518 = vmatpush1.bf16.msra.mxu0 %v3269_v22  ;;  %2550 = vmatpush1.bf16.msra.mxu1 %v3273_v23 }
 0x2a1   :  { %2520 = vmatprep.subr.bf16.mxu0 %v3275_v24  ;;  %2552 = vmatprep.subr.bf16.mxu1 %v3278_v28 }
 0x2a4   :  { %2522 = vmatpush1.bf16.msra.mxu0 %v3281_v34  ;;  %2554 = vmatpush1.bf16.msra.mxu1 %v3285_v35 }
 0x2a5   :  { %2524 = vmatprep.subr.bf16.mxu0 %v3287_v36  ;;  %2556 = vmatprep.subr.bf16.mxu1 %v3290_v41 }
 0x2a8   :  { %2526 = vmatpush1.bf16.msra.mxu0 %v3293_v48  ;;  %2558 = vmatpush1.bf16.msra.mxu1 %v3297_v52 }
 0x2a9   :  { %2528 = vmatprep.subr.bf16.mxu0 %v3299_v53  ;;  %2560 = vmatprep.subr.bf16.mxu1 %v3302_v58 }
 0x2ac   :  { %2530 = vmatpush1.bf16.msra.mxu0 %v3305_v5  ;;  %2562 = vmatpush1.bf16.msra.mxu1 %v3309_v6 }
 0x2ad   :  { %2532 = vmatprep.subr.bf16.mxu0 %v3311_v7  ;;  %2564 = vmatprep.subr.bf16.mxu1 %v3314_v13 }
 0x2b0   :  { %2534 = vmatpush1.bf16.msra.mxu0 %v3317_v17  ;;  %2566 = vmatpush1.bf16.msra.mxu1 %v3321_v18 }
 0x2b1   :  { %2568 = vmatprep.subr.bf16.mxu0 %v3225_v38  ;;  %2600 = vmatprep.subr.bf16.mxu1 %v3227_v42 }
 0x366   :  { %v858_v57 = vpop.f32.mrb[6].mxu0  ;;  %v929_v15 = vpop.f32.mrb[6].mxu1 }
 0x367   :  { %v860_v19 = vpop.f32.mrb[7].mxu0  ;;  %v931_v21 = vpop.f32.mrb[7].mxu1 }
 0x368   :  { %v938_v25 = vcombine.low %v858_v57, %v860_v19  ;;  %v939_v26 = vcombine.low %v929_v15, %v931_v21 }
 0x36a   :  { %v946_v27 = vrot.slane %v938_v25, %v3364_v59  ;;  %v953_v29 = vrot.slane %v939_v26, %v3364_v59 }
 0x36c   :  { %v954_v20 = vcombine.low %v946_v27, %v953_v29 }
 0x36e   :  { %v961_v30 = vrot.slane %v954_v20, %v3364_v59 }
 0x370   :  { %v963_v32 = vadd.f32 %v961_v30, %v791_v31 }
 0x372   :  { %v2174_v33 = vmul.f32 -1.442695, %v963_v32  ;;  %v971_v37 = vrot.slane %v963_v32, 1  ;;  %v982_v40 = vrot.slane %v963_v32, 3  ;;  %v979_v45 = vrot.slane %v963_v32, 2 }
 0x374   :  { %2891 = vpow2.f32 %v2174_v33  ;;  %v2175_v39 = vmul.f32 -1.442695, %v971_v37  ;;  %v2176_v43 = vmul.f32 -1.442695, %v982_v40 }
 0x375   :  { %v997_v37 = vld [vmem:[#allocation2 + $0x3] ss:$8 sm:$0xf] }
 0x376   :  { %2893 = vpow2.f32 %v2175_v39 }
 0x377   :  { %2895 = vpow2.f32 %v2176_v43 }
 0x37e   :  { %v2892_v44 = vpop.eup %2891 }
 0x37f   :  { %v967_v46 = vadd.f32 1.0, %v2892_v44 }
 0x380   :  { %v2894_v47 = vpop.eup %2893 }
 0x381   :  { %2897 = vrcp.f32 %v967_v46  ;;  %v976_v54 = vadd.f32 1.0, %v2894_v47  ;;  %v2896_v56 = vpop.eup %2895 }
 0x382   :  { %2899 = vtanh.f32 %v979_v45  ;;  %v987_v8 = vadd.f32 1.0, %v2896_v56 }
 0x383   :  { %2901 = vrcp.f32 %v976_v54 }
 0x384   :  { %2903 = vrcp.f32 %v987_v8 }
 0x38b   :  { %v2898_v60 = vpop.eup %2897 }
 0x38c   :  { %v2900_v1 = vpop.eup %2899 }
 0x38d   :  { %v2902_v2 = vpop.eup %2901  ;;  %v991_v14 = vmul.f32 %v2900_v1, %v2898_v60 }
 0x38e   :  { %v990_v9 = vmul.f32 %v2902_v2, %v3410_v3  ;;  %v2904_v15 = vpop.eup %2903 }
 0x390   :  { %v3451_v57 = vadd.f32 %v991_v14, %v990_v9 }
 0x392   :  { %2905 = vtanh.f32 %v3451_v57 }
 0x39c   :  { %v2906_v19 = vpop.eup %2905 }
 0x39d   :  { %v994_v21 = vmul.f32 %v2906_v19, %v2904_v15 }
 0x39f   :  { %995 = vst [vmem:[#allocation3 + $0x2] sm:$0x1] %v994_v21  ;;  %1063 = vmatmul.mubr.f32.vlgmr.msra.gmra.mrb[8].mxu0 %v994_v21  ;;  %1134 = vmatmul.mubr.f32.vlgmr.msra.gmra.mrb[8].mxu1 %v994_v21 }
 0x3a0   :  { %2570 = vmatpush1.bf16.msra.mxu0 %v3232_v49  ;;  %2602 = vmatpush1.bf16.msra.mxu1 %v3235_v50 }
 0x3a1   :  { %2572 = vmatprep.subr.bf16.mxu0 %v3237_v51  ;;  %2604 = vmatprep.subr.bf16.mxu1 %v3240_v55 }
 0x3a2   :  { %1268 = vmatprep.mubr.f32.mxu0 %v3138_v0  ;;  %1339 = vmatprep.mubr.f32.mxu1 %v3138_v0 }
 0x3a4   :  { %2574 = vmatpush1.bf16.msra.mxu0 %v3243_v61  ;;  %2606 = vmatpush1.bf16.msra.mxu1 %v3247_v62 }
 0x3a5   :  { %2576 = vmatprep.subr.bf16.mxu0 %v3249_v63  ;;  %2608 = vmatprep.subr.bf16.mxu1 %v3252_v4 }
 0x3a8   :  { %2578 = vmatpush1.bf16.msra.mxu0 %v3257_v10  ;;  %2610 = vmatpush1.bf16.msra.mxu1 %v3261_v11 }
 0x3a9   :  { %2580 = vmatprep.subr.bf16.mxu0 %v3263_v12  ;;  %2612 = vmatprep.subr.bf16.mxu1 %v3266_v16 }
 0x3ac   :  { %2582 = vmatpush1.bf16.msra.mxu0 %v3269_v22  ;;  %2614 = vmatpush1.bf16.msra.mxu1 %v3273_v23 }
 0x3ad   :  { %2584 = vmatprep.subr.bf16.mxu0 %v3275_v24  ;;  %2616 = vmatprep.subr.bf16.mxu1 %v3278_v28 }
 0x3b0   :  { %2586 = vmatpush1.bf16.msra.mxu0 %v3281_v34  ;;  %2618 = vmatpush1.bf16.msra.mxu1 %v3285_v35 }
 0x3b1   :  { %2588 = vmatprep.subr.bf16.mxu0 %v3287_v36  ;;  %2620 = vmatprep.subr.bf16.mxu1 %v3290_v41 }
 0x3b4   :  { %2590 = vmatpush1.bf16.msra.mxu0 %v3293_v48  ;;  %2622 = vmatpush1.bf16.msra.mxu1 %v3297_v52 }
 0x3b5   :  { %2592 = vmatprep.subr.bf16.mxu0 %v3299_v53  ;;  %2624 = vmatprep.subr.bf16.mxu1 %v3302_v58 }
 0x3b8   :  { %2594 = vmatpush1.bf16.msra.mxu0 %v3305_v5  ;;  %2626 = vmatpush1.bf16.msra.mxu1 %v3309_v6 }
 0x3b9   :  { %2596 = vmatprep.subr.bf16.mxu0 %v3311_v7  ;;  %2628 = vmatprep.subr.bf16.mxu1 %v3314_v13 }
 0x3bc   :  { %2598 = vmatpush1.bf16.msra.mxu0 %v3317_v17  ;;  %2630 = vmatpush1.bf16.msra.mxu1 %v3321_v18 }
 0x3bd   :  { %2632 = vmatprep.subr.bf16.mxu0 %v3225_v38  ;;  %2664 = vmatprep.subr.bf16.mxu1 %v3227_v42 }
 0x472   :  { %v1064_v3 = vpop.f32.mrb[8].mxu0  ;;  %v1135_v25 = vpop.f32.mrb[8].mxu1 }
 0x473   :  { %v1066_v26 = vpop.f32.mrb[9].mxu0  ;;  %v1137_v27 = vpop.f32.mrb[9].mxu1 }
 0x474   :  { %v1144_v29 = vcombine.low %v1064_v3, %v1066_v26  ;;  %v1145_v20 = vcombine.low %v1135_v25, %v1137_v27 }
 0x476   :  { %v1152_v30 = vrot.slane %v1144_v29, %v3364_v59  ;;  %v1159_v31 = vrot.slane %v1145_v20, %v3364_v59 }
 0x478   :  { %v1160_v32 = vcombine.low %v1152_v30, %v1159_v31 }
 0x47a   :  { %v1167_v33 = vrot.slane %v1160_v32, %v3364_v59 }
 0x47c   :  { %v1169_v39 = vadd.f32 %v1167_v33, %v997_v37 }
 0x47e   :  { %v2177_v40 = vmul.f32 -1.442695, %v1169_v39  ;;  %v1177_v43 = vrot.slane %v1169_v39, 1  ;;  %v1188_v45 = vrot.slane %v1169_v39, 3  ;;  %v1185_v54 = vrot.slane %v1169_v39, 2 }
 0x480   :  { %2907 = vpow2.f32 %v2177_v40  ;;  %v2178_v44 = vmul.f32 -1.442695, %v1177_v43  ;;  %v2179_v46 = vmul.f32 -1.442695, %v1188_v45 }
 0x481   :  { %v1203_v43 = vld [vmem:[#allocation2 + $0x4] ss:$8 sm:$0xf] }
 0x482   :  { %2909 = vpow2.f32 %v2178_v44 }
 0x483   :  { %2911 = vpow2.f32 %v2179_v46 }
 0x48a   :  { %v2908_v47 = vpop.eup %2907 }
 0x48b   :  { %v1173_v56 = vadd.f32 1.0, %v2908_v47 }
 0x48c   :  { %v2910_v60 = vpop.eup %2909 }
 0x48d   :  { %2913 = vrcp.f32 %v1173_v56  ;;  %v1182_v1 = vadd.f32 1.0, %v2910_v60  ;;  %v2912_v2 = vpop.eup %2911 }
 0x48e   :  { %2915 = vtanh.f32 %v1185_v54  ;;  %v1193_v15 = vadd.f32 1.0, %v2912_v2 }
 0x48f   :  { %2917 = vrcp.f32 %v1182_v1 }
 0x490   :  { %2919 = vrcp.f32 %v1193_v15 }
 0x497   :  { %v2914_v8 = vpop.eup %2913 }
 0x498   :  { %v2916_v9 = vpop.eup %2915 }
 0x499   :  { %v2918_v14 = vpop.eup %2917  ;;  %v1197_v21 = vmul.f32 %v2916_v9, %v2914_v8 }
 0x49a   :  { %v1196_v19 = vmul.f32 %v2918_v14, %v3451_v57  ;;  %v2920_v25 = vpop.eup %2919 }
 0x49c   :  { %v3492_v3 = vadd.f32 %v1197_v21, %v1196_v19 }
 0x49e   :  { %2921 = vtanh.f32 %v3492_v3 }
 0x4a8   :  { %v2922_v26 = vpop.eup %2921 }
 0x4a9   :  { %v1200_v27 = vmul.f32 %v2922_v26, %v2920_v25 }
 0x4ab   :  { %1201 = vst [vmem:[#allocation3 + $0x3] sm:$0x1] %v1200_v27  ;;  %1269 = vmatmul.mubr.f32.vlgmr.msra.gmra.mrb[10].mxu0 %v1200_v27  ;;  %1340 = vmatmul.mubr.f32.vlgmr.msra.gmra.mrb[10].mxu1 %v1200_v27 }
 0x4ac   :  { %2634 = vmatpush1.bf16.msra.mxu0 %v3232_v49  ;;  %2666 = vmatpush1.bf16.msra.mxu1 %v3235_v50 }
 0x4ad   :  { %2636 = vmatprep.subr.bf16.mxu0 %v3237_v51  ;;  %2668 = vmatprep.subr.bf16.mxu1 %v3240_v55 }
 0x4ae   :  { %1474 = vmatprep.mubr.f32.mxu0 %v3138_v0  ;;  %1545 = vmatprep.mubr.f32.mxu1 %v3138_v0 }
 0x4b0   :  { %2638 = vmatpush1.bf16.msra.mxu0 %v3243_v61  ;;  %2670 = vmatpush1.bf16.msra.mxu1 %v3247_v62 }
 0x4b1   :  { %2640 = vmatprep.subr.bf16.mxu0 %v3249_v63  ;;  %2672 = vmatprep.subr.bf16.mxu1 %v3252_v4 }
 0x4b4   :  { %2642 = vmatpush1.bf16.msra.mxu0 %v3257_v10  ;;  %2674 = vmatpush1.bf16.msra.mxu1 %v3261_v11 }
 0x4b5   :  { %2644 = vmatprep.subr.bf16.mxu0 %v3263_v12  ;;  %2676 = vmatprep.subr.bf16.mxu1 %v3266_v16 }
 0x4b8   :  { %2646 = vmatpush1.bf16.msra.mxu0 %v3269_v22  ;;  %2678 = vmatpush1.bf16.msra.mxu1 %v3273_v23 }
 0x4b9   :  { %2648 = vmatprep.subr.bf16.mxu0 %v3275_v24  ;;  %2680 = vmatprep.subr.bf16.mxu1 %v3278_v28 }
 0x4bc   :  { %2650 = vmatpush1.bf16.msra.mxu0 %v3281_v34  ;;  %2682 = vmatpush1.bf16.msra.mxu1 %v3285_v35 }
 0x4bd   :  { %2652 = vmatprep.subr.bf16.mxu0 %v3287_v36  ;;  %2684 = vmatprep.subr.bf16.mxu1 %v3290_v41 }
 0x4c0   :  { %2654 = vmatpush1.bf16.msra.mxu0 %v3293_v48  ;;  %2686 = vmatpush1.bf16.msra.mxu1 %v3297_v52 }
 0x4c1   :  { %2656 = vmatprep.subr.bf16.mxu0 %v3299_v53  ;;  %2688 = vmatprep.subr.bf16.mxu1 %v3302_v58 }
 0x4c4   :  { %2658 = vmatpush1.bf16.msra.mxu0 %v3305_v5  ;;  %2690 = vmatpush1.bf16.msra.mxu1 %v3309_v6 }
 0x4c5   :  { %2660 = vmatprep.subr.bf16.mxu0 %v3311_v7  ;;  %2692 = vmatprep.subr.bf16.mxu1 %v3314_v13 }
 0x4c8   :  { %2662 = vmatpush1.bf16.msra.mxu0 %v3317_v17  ;;  %2694 = vmatpush1.bf16.msra.mxu1 %v3321_v18 }
 0x4c9   :  { %2696 = vmatprep.subr.bf16.mxu0 %v3225_v38  ;;  %2728 = vmatprep.subr.bf16.mxu1 %v3227_v42 }
 0x57e   :  { %v1270_v57 = vpop.f32.mrb[10].mxu0  ;;  %v1341_v29 = vpop.f32.mrb[10].mxu1 }
 0x57f   :  { %v1272_v20 = vpop.f32.mrb[11].mxu0  ;;  %v1343_v30 = vpop.f32.mrb[11].mxu1 }
 0x580   :  { %v1350_v31 = vcombine.low %v1270_v57, %v1272_v20  ;;  %v1351_v32 = vcombine.low %v1341_v29, %v1343_v30 }
 0x582   :  { %v1358_v33 = vrot.slane %v1350_v31, %v3364_v59  ;;  %v1365_v37 = vrot.slane %v1351_v32, %v3364_v59 }
 0x584   :  { %v1366_v39 = vcombine.low %v1358_v33, %v1365_v37 }
 0x586   :  { %v1373_v40 = vrot.slane %v1366_v39, %v3364_v59 }
 0x588   :  { %v1375_v44 = vadd.f32 %v1373_v40, %v1203_v43 }
 0x58a   :  { %v2180_v45 = vmul.f32 -1.442695, %v1375_v44  ;;  %v1383_v46 = vrot.slane %v1375_v44, 1  ;;  %v1394_v54 = vrot.slane %v1375_v44, 3  ;;  %v1391_v1 = vrot.slane %v1375_v44, 2 }
 0x58c   :  { %2923 = vpow2.f32 %v2180_v45  ;;  %v2181_v47 = vmul.f32 -1.442695, %v1383_v46  ;;  %v2182_v56 = vmul.f32 -1.442695, %v1394_v54 }
 0x58d   :  { %v1409_v46 = vld [vmem:[#allocation2 + $0x5] ss:$8 sm:$0xf] }
 0x58e   :  { %2925 = vpow2.f32 %v2181_v47 }
 0x58f   :  { %2927 = vpow2.f32 %v2182_v56 }
 0x596   :  { %v2924_v60 = vpop.eup %2923 }
 0x597   :  { %v1379_v2 = vadd.f32 1.0, %v2924_v60 }
 0x598   :  { %v2926_v8 = vpop.eup %2925 }
 0x599   :  { %2929 = vrcp.f32 %v1379_v2  ;;  %v1388_v9 = vadd.f32 1.0, %v2926_v8  ;;  %v2928_v14 = vpop.eup %2927 }
 0x59a   :  { %2931 = vtanh.f32 %v1391_v1  ;;  %v1399_v25 = vadd.f32 1.0, %v2928_v14 }
 0x59b   :  { %2933 = vrcp.f32 %v1388_v9 }
 0x59c   :  { %2935 = vrcp.f32 %v1399_v25 }
 0x5a3   :  { %v2930_v15 = vpop.eup %2929 }
 0x5a4   :  { %v2932_v19 = vpop.eup %2931 }
 0x5a5   :  { %v2934_v21 = vpop.eup %2933  ;;  %v1403_v27 = vmul.f32 %v2932_v19, %v2930_v15 }
 0x5a6   :  { %v1402_v26 = vmul.f32 %v2934_v21, %v3492_v3  ;;  %v2936_v29 = vpop.eup %2935 }
 0x5a8   :  { %v3533_v57 = vadd.f32 %v1403_v27, %v1402_v26 }
 0x5aa   :  { %2937 = vtanh.f32 %v3533_v57 }
 0x5b4   :  { %v2938_v20 = vpop.eup %2937 }
 0x5b5   :  { %v1406_v30 = vmul.f32 %v2938_v20, %v2936_v29 }
 0x5b7   :  { %1407 = vst [vmem:[#allocation3 + $0x4] sm:$0x1] %v1406_v30  ;;  %1475 = vmatmul.mubr.f32.vlgmr.msra.gmra.mrb[12].mxu0 %v1406_v30  ;;  %1546 = vmatmul.mubr.f32.vlgmr.msra.gmra.mrb[12].mxu1 %v1406_v30 }
 0x5b8   :  { %2698 = vmatpush1.bf16.msra.mxu0 %v3232_v49  ;;  %2730 = vmatpush1.bf16.msra.mxu1 %v3235_v50 }
 0x5b9   :  { %2700 = vmatprep.subr.bf16.mxu0 %v3237_v51  ;;  %2732 = vmatprep.subr.bf16.mxu1 %v3240_v55 }
 0x5ba   :  { %1680 = vmatprep.mubr.f32.mxu0 %v3138_v0  ;;  %1751 = vmatprep.mubr.f32.mxu1 %v3138_v0 }
 0x5bc   :  { %2702 = vmatpush1.bf16.msra.mxu0 %v3243_v61  ;;  %2734 = vmatpush1.bf16.msra.mxu1 %v3247_v62 }
 0x5bd   :  { %2704 = vmatprep.subr.bf16.mxu0 %v3249_v63  ;;  %2736 = vmatprep.subr.bf16.mxu1 %v3252_v4 }
 0x5c0   :  { %2706 = vmatpush1.bf16.msra.mxu0 %v3257_v10  ;;  %2738 = vmatpush1.bf16.msra.mxu1 %v3261_v11 }
 0x5c1   :  { %2708 = vmatprep.subr.bf16.mxu0 %v3263_v12  ;;  %2740 = vmatprep.subr.bf16.mxu1 %v3266_v16 }
 0x5c4   :  { %2710 = vmatpush1.bf16.msra.mxu0 %v3269_v22  ;;  %2742 = vmatpush1.bf16.msra.mxu1 %v3273_v23 }
 0x5c5   :  { %2712 = vmatprep.subr.bf16.mxu0 %v3275_v24  ;;  %2744 = vmatprep.subr.bf16.mxu1 %v3278_v28 }
 0x5c8   :  { %2714 = vmatpush1.bf16.msra.mxu0 %v3281_v34  ;;  %2746 = vmatpush1.bf16.msra.mxu1 %v3285_v35 }
 0x5c9   :  { %2716 = vmatprep.subr.bf16.mxu0 %v3287_v36  ;;  %2748 = vmatprep.subr.bf16.mxu1 %v3290_v41 }
 0x5cc   :  { %2718 = vmatpush1.bf16.msra.mxu0 %v3293_v48  ;;  %2750 = vmatpush1.bf16.msra.mxu1 %v3297_v52 }
 0x5cd   :  { %2720 = vmatprep.subr.bf16.mxu0 %v3299_v53  ;;  %2752 = vmatprep.subr.bf16.mxu1 %v3302_v58 }
 0x5d0   :  { %2722 = vmatpush1.bf16.msra.mxu0 %v3305_v5  ;;  %2754 = vmatpush1.bf16.msra.mxu1 %v3309_v6 }
 0x5d1   :  { %2724 = vmatprep.subr.bf16.mxu0 %v3311_v7  ;;  %2756 = vmatprep.subr.bf16.mxu1 %v3314_v13 }
 0x5d4   :  { %2726 = vmatpush1.bf16.msra.mxu0 %v3317_v17  ;;  %2758 = vmatpush1.bf16.msra.mxu1 %v3321_v18 }
 0x5d5   :  { %2760 = vmatprep.subr.bf16.mxu0 %v3225_v38  ;;  %2792 = vmatprep.subr.bf16.mxu1 %v3227_v42 }
 0x68a   :  { %v1476_v3 = vpop.f32.mrb[12].mxu0  ;;  %v1547_v31 = vpop.f32.mrb[12].mxu1 }
 0x68b   :  { %v1478_v32 = vpop.f32.mrb[13].mxu0  ;;  %v1549_v33 = vpop.f32.mrb[13].mxu1 }
 0x68c   :  { %v1556_v37 = vcombine.low %v1476_v3, %v1478_v32  ;;  %v1557_v39 = vcombine.low %v1547_v31, %v1549_v33 }
 0x68e   :  { %v1564_v40 = vrot.slane %v1556_v37, %v3364_v59  ;;  %v1571_v43 = vrot.slane %v1557_v39, %v3364_v59 }
 0x690   :  { %v1572_v44 = vcombine.low %v1564_v40, %v1571_v43 }
 0x692   :  { %v1579_v45 = vrot.slane %v1572_v44, %v3364_v59 }
 0x694   :  { %v1581_v47 = vadd.f32 %v1579_v45, %v1409_v46 }
 0x696   :  { %v2183_v54 = vmul.f32 -1.442695, %v1581_v47  ;;  %v1589_v56 = vrot.slane %v1581_v47, 1  ;;  %v1600_v42 = vrot.slane %v1581_v47, 3  ;;  %v1597_v2 = vrot.slane %v1581_v47, 2 }
 0x698   :  { %2939 = vpow2.f32 %v2183_v54  ;;  %v2184_v38 = vmul.f32 -1.442695, %v1589_v56  ;;  %v2185_v60 = vmul.f32 -1.442695, %v1600_v42 }
 0x69a   :  { %2941 = vpow2.f32 %v2184_v38 }
 0x69b   :  { %2943 = vpow2.f32 %v2185_v60 }
 0x6a2   :  { %v2940_v1 = vpop.eup %2939 }
 0x6a3   :  { %v1585_v8 = vadd.f32 1.0, %v2940_v1 }
 0x6a4   :  { %v2942_v9 = vpop.eup %2941 }
 0x6a5   :  { %2945 = vrcp.f32 %v1585_v8  ;;  %v1594_v14 = vadd.f32 1.0, %v2942_v9  ;;  %v2944_v15 = vpop.eup %2943 }
 0x6a6   :  { %2947 = vtanh.f32 %v1597_v2  ;;  %v1605_v26 = vadd.f32 1.0, %v2944_v15 }
 0x6a7   :  { %2949 = vrcp.f32 %v1594_v14 }
 0x6a8   :  { %2951 = vrcp.f32 %v1605_v26 }
 0x6af   :  { %v2946_v19 = vpop.eup %2945 }
 0x6b0   :  { %v2948_v21 = vpop.eup %2947 }
 0x6b1   :  { %v2950_v25 = vpop.eup %2949  ;;  %v1609_v29 = vmul.f32 %v2948_v21, %v2946_v19 }
 0x6b2   :  { %v1608_v27 = vmul.f32 %v2950_v25, %v3533_v57  ;;  %v2952_v30 = vpop.eup %2951 }
 0x6b4   :  { %v3574_v20 = vadd.f32 %v1609_v29, %v1608_v27 }
 0x6b6   :  { %2953 = vtanh.f32 %v3574_v20 }
 0x6c0   :  { %v2954_v3 = vpop.eup %2953 }
 0x6c1   :  { %v1612_v31 = vmul.f32 %v2954_v3, %v2952_v30 }
 0x6c3   :  { %1613 = vst [vmem:[#allocation3 + $0x5] sm:$0x1] %v1612_v31  ;;  %1681 = vmatmul.mubr.f32.vlgmr.msra.gmra.mrb[14].mxu0 %v1612_v31  ;;  %1752 = vmatmul.mubr.f32.vlgmr.msra.gmra.mrb[14].mxu1 %v1612_v31 }
 0x6c4   :  { %2762 = vmatpush1.bf16.msra.mxu0 %v3232_v49  ;;  %2794 = vmatpush1.bf16.msra.mxu1 %v3235_v50 }
 0x6c5   :  { %2764 = vmatprep.subr.bf16.mxu0 %v3237_v51  ;;  %2796 = vmatprep.subr.bf16.mxu1 %v3240_v55 }
 0x6c6   :  { %1886 = vmatprep.mubr.f32.mxu0 %v3138_v0  ;;  %1957 = vmatprep.mubr.f32.mxu1 %v3138_v0 }
 0x6c8   :  { %2766 = vmatpush1.bf16.msra.mxu0 %v3243_v61  ;;  %2798 = vmatpush1.bf16.msra.mxu1 %v3247_v62 }
 0x6c9   :  { %2768 = vmatprep.subr.bf16.mxu0 %v3249_v63  ;;  %2800 = vmatprep.subr.bf16.mxu1 %v3252_v4 }
 0x6cc   :  { %2770 = vmatpush1.bf16.msra.mxu0 %v3257_v10  ;;  %2802 = vmatpush1.bf16.msra.mxu1 %v3261_v11 }
 0x6cd   :  { %2772 = vmatprep.subr.bf16.mxu0 %v3263_v12  ;;  %2804 = vmatprep.subr.bf16.mxu1 %v3266_v16  ;;  %v1615_v12 = vld [vmem:[#allocation2 + $0x6] ss:$8 sm:$0xf] }
 0x6d0   :  { %2774 = vmatpush1.bf16.msra.mxu0 %v3269_v22  ;;  %2806 = vmatpush1.bf16.msra.mxu1 %v3273_v23 }
 0x6d1   :  { %2776 = vmatprep.subr.bf16.mxu0 %v3275_v24  ;;  %2808 = vmatprep.subr.bf16.mxu1 %v3278_v28 }
 0x6d4   :  { %2778 = vmatpush1.bf16.msra.mxu0 %v3281_v34  ;;  %2810 = vmatpush1.bf16.msra.mxu1 %v3285_v35 }
 0x6d5   :  { %2780 = vmatprep.subr.bf16.mxu0 %v3287_v36  ;;  %2812 = vmatprep.subr.bf16.mxu1 %v3290_v41 }
 0x6d8   :  { %2782 = vmatpush1.bf16.msra.mxu0 %v3293_v48  ;;  %2814 = vmatpush1.bf16.msra.mxu1 %v3297_v52 }
 0x6d9   :  { %2784 = vmatprep.subr.bf16.mxu0 %v3299_v53  ;;  %2816 = vmatprep.subr.bf16.mxu1 %v3302_v58 }
 0x6dc   :  { %2786 = vmatpush1.bf16.msra.mxu0 %v3305_v5  ;;  %2818 = vmatpush1.bf16.msra.mxu1 %v3309_v6 }
 0x6dd   :  { %2788 = vmatprep.subr.bf16.mxu0 %v3311_v7  ;;  %2820 = vmatprep.subr.bf16.mxu1 %v3314_v13 }
 0x6e0   :  { %2790 = vmatpush1.bf16.msra.mxu0 %v3317_v17  ;;  %2822 = vmatpush1.bf16.msra.mxu1 %v3321_v18 }
 0x796   :  { %v1682_v49 = vpop.f32.mrb[14].mxu0  ;;  %v1753_v50 = vpop.f32.mrb[14].mxu1 }
 0x797   :  { %v1684_v51 = vpop.f32.mrb[15].mxu0  ;;  %v1755_v55 = vpop.f32.mrb[15].mxu1 }
 0x798   :  { %v1762_v61 = vcombine.low %v1682_v49, %v1684_v51  ;;  %v1763_v62 = vcombine.low %v1753_v50, %v1755_v55 }
 0x79a   :  { %v1770_v63 = vrot.slane %v1762_v61, %v3364_v59  ;;  %v1777_v4 = vrot.slane %v1763_v62, %v3364_v59 }
 0x79c   :  { %v1778_v10 = vcombine.low %v1770_v63, %v1777_v4 }
 0x79e   :  { %v1785_v11 = vrot.slane %v1778_v10, %v3364_v59 }
 0x7a0   :  { %v1787_v16 = vadd.f32 %v1785_v11, %v1615_v12 }
 0x7a2   :  { %v2186_v22 = vmul.f32 -1.442695, %v1787_v16  ;;  %v1795_v23 = vrot.slane %v1787_v16, 1  ;;  %v1806_v28 = vrot.slane %v1787_v16, 3  ;;  %v1803_v36 = vrot.slane %v1787_v16, 2 }
 0x7a4   :  { %2955 = vpow2.f32 %v2186_v22  ;;  %v2187_v24 = vmul.f32 -1.442695, %v1795_v23  ;;  %v2188_v34 = vmul.f32 -1.442695, %v1806_v28 }
 0x7a6   :  { %2957 = vpow2.f32 %v2187_v24 }
 0x7a7   :  { %2959 = vpow2.f32 %v2188_v34 }
 0x7ae   :  { %v2956_v35 = vpop.eup %2955 }
 0x7af   :  { %v1791_v41 = vadd.f32 1.0, %v2956_v35 }
 0x7b0   :  { %v2958_v48 = vpop.eup %2957 }
 0x7b1   :  { %2961 = vrcp.f32 %v1791_v41  ;;  %v1800_v52 = vadd.f32 1.0, %v2958_v48  ;;  %v2960_v53 = vpop.eup %2959 }
 0x7b2   :  { %2963 = vtanh.f32 %v1803_v36  ;;  %v1811_v7 = vadd.f32 1.0, %v2960_v53 }
 0x7b3   :  { %2965 = vrcp.f32 %v1800_v52 }
 0x7b4   :  { %2967 = vrcp.f32 %v1811_v7 }
 0x7bb   :  { %v2962_v58 = vpop.eup %2961 }
 0x7bc   :  { %v2964_v5 = vpop.eup %2963 }
 0x7bd   :  { %v2966_v6 = vpop.eup %2965  ;;  %v1815_v17 = vmul.f32 %v2964_v5, %v2962_v58 }
 0x7be   :  { %v1814_v13 = vmul.f32 %v2966_v6, %v3574_v20  ;;  %v2968_v57 = vpop.eup %2967 }
 0x7c0   :  { %v3613_v18 = vadd.f32 %v1815_v17, %v1814_v13 }
 0x7c2   :  { %2969 = vtanh.f32 %v3613_v18 }
 0x7cc   :  { %v2970_v32 = vpop.eup %2969 }
 0x7cd   :  { %v1818_v33 = vmul.f32 %v2970_v32, %v2968_v57 }
 0x7cf   :  { %1819 = vst [vmem:[#allocation3 + $0x6] sm:$0x1] %v1818_v33  ;;  %1887 = vmatmul.mubr.f32.vlgmr.msra.gmra.mrb[16].mxu0 %v1818_v33  ;;  %1958 = vmatmul.mubr.f32.vlgmr.msra.gmra.mrb[16].mxu1 %v1818_v33 }
 0x7d0   :  { %3066 = shalt.err (!%p3063_p12)  }
 0x7d1   :  { %s3067_s20 = scalar_lea.vmem %s67_s10, 2048  ;;  %p3072_p0 = scmp.lt.s32.totalorder %s67_s10, %s67_s10 }
 0x7d2   :  { %p3068_p13 = scmp.ne.s32.totalorder %s67_s10, %s3067_s20  ;;  %p3073_p1 = scmp.lt.s32.totalorder %s3067_s20, %s3067_s20 }
 0x7d4   :  { %p3074_p2 = por %p3073_p1, %p3072_p0 }
 0x7d6   :  { %p3075_p3 = pnand %p3074_p2, %p3068_p13 }
 0x7d8   :  { %3078 = shalt.err (!%p3075_p3)  }
 0x7d9   :  { %69 = dma.hbm_to_vmem [thread:$0]  %s3661_s4, 2048, %s67_s10, [#allocation6] }
 0x7da   :  { %s3079_s25 = scalar_lea.hbm %s3662_s5, 16 }
 0x7db   :  { %p3080_p4 = scmp.ne.s32.totalorder %s3662_s5, %s3079_s25  ;;  %p3083_p5 = scmp.lt.u32.totalorder %s3079_s25, %s3662_s5 }
 0x7dd   :  { %p3085_p6 = pnand %p3083_p5, %p3080_p4 }
 0x7df   :  { %3088 = shalt.err (!%p3085_p6)  }
 0x7e0   :  { %s3089_s30 = scalar_lea.vmem %s79_s12, 16  ;;  %p3094_p8 = scmp.lt.s32.totalorder %s79_s12, %s79_s12 }
 0x7e1   :  { %p3090_p7 = scmp.ne.s32.totalorder %s79_s12, %s3089_s30  ;;  %p3095_p9 = scmp.lt.s32.totalorder %s3089_s30, %s3089_s30 }
 0x7e3   :  { %p3096_p10 = por %p3095_p9, %p3094_p8 }
 0x7e5   :  { %p3097_p11 = pnand %p3096_p10, %p3090_p7 }
 0x7e7   :  { %3100 = shalt.err (!%p3097_p11)  }
 0x7e8   :  { %81 = dma.hbm_to_vmem [thread:$0]  %s3662_s5, 16, %s79_s12, [#allocation6 + $0x1]  ;;  %v1821_v38 = vld [vmem:[#allocation2 + $0x7] ss:$8 sm:$0xf] }
 0x8a2   :  { %v1888_v37 = vpop.f32.mrb[16].mxu0  ;;  %v1959_v39 = vpop.f32.mrb[16].mxu1 }
 0x8a3   :  { %v1890_v40 = vpop.f32.mrb[17].mxu0  ;;  %v1961_v43 = vpop.f32.mrb[17].mxu1 }
 0x8a4   :  { %v1968_v44 = vcombine.low %v1888_v37, %v1890_v40  ;;  %v1969_v45 = vcombine.low %v1959_v39, %v1961_v43 }
 0x8a6   :  { %v1976_v46 = vrot.slane %v1968_v44, %v3364_v59  ;;  %v1983_v47 = vrot.slane %v1969_v45, %v3364_v59 }
 0x8a8   :  { %v1984_v54 = vcombine.low %v1976_v46, %v1983_v47 }
 0x8aa   :  { %v1991_v56 = vrot.slane %v1984_v54, %v3364_v59 }
 0x8ac   :  { %v1993_v42 = vadd.f32 %v1991_v56, %v1821_v38 }
 0x8ae   :  { %v2189_v60 = vmul.f32 -1.442695, %v1993_v42  ;;  %v2001_v1 = vrot.slane %v1993_v42, 1  ;;  %v2012_v8 = vrot.slane %v1993_v42, 3  ;;  %v2009_v15 = vrot.slane %v1993_v42, 2 }
 0x8b0   :  { %2971 = vpow2.f32 %v2189_v60  ;;  %v2190_v2 = vmul.f32 -1.442695, %v2001_v1  ;;  %v2191_v9 = vmul.f32 -1.442695, %v2012_v8 }
 0x8b2   :  { %2973 = vpow2.f32 %v2190_v2 }
 0x8b3   :  { %2975 = vpow2.f32 %v2191_v9 }
 0x8ba   :  { %v2972_v14 = vpop.eup %2971 }
 0x8bb   :  { %v1997_v19 = vadd.f32 1.0, %v2972_v14 }
 0x8bc   :  { %v2974_v21 = vpop.eup %2973 }
 0x8bd   :  { %2977 = vrcp.f32 %v1997_v19  ;;  %v2006_v25 = vadd.f32 1.0, %v2974_v21  ;;  %v2976_v26 = vpop.eup %2975 }
 0x8be   :  { %2979 = vtanh.f32 %v2009_v15  ;;  %v2017_v20 = vadd.f32 1.0, %v2976_v26 }
 0x8bf   :  { %2981 = vrcp.f32 %v2006_v25 }
 0x8c0   :  { %2983 = vrcp.f32 %v2017_v20 }
 0x8c7   :  { %v2978_v59 = vpop.eup %2977 }
 0x8c8   :  { %v2980_v27 = vpop.eup %2979 }
 0x8c9   :  { %v2982_v29 = vpop.eup %2981  ;;  %v2021_v3 = vmul.f32 %v2980_v27, %v2978_v59 }
 0x8ca   :  { %v2020_v30 = vmul.f32 %v2982_v29, %v3613_v18  ;;  %v2984_v49 = vpop.eup %2983 }
 0x8cc   :  { %v2022_v31 = vadd.f32 %v2021_v3, %v2020_v30 }
 0x8ce   :  { %2985 = vtanh.f32 %v2022_v31 }
 0x8d8   :  { %v2986_v50 = vpop.eup %2985 }
 0x8d9   :  { %v2024_v51 = vmul.f32 %v2986_v50, %v2984_v49 }
 0x8db   :  { %2025 = vst [vmem:[#allocation3 + $0x7] sm:$0x1] %v2024_v51 }
 0x8dc   :  { %3127 = dma.done.wait [#allocation6], 2048 }
 0x8dd   :  { %3128 = vsyncadd [#allocation6], 4294965248 }
 0x8de   :  { %3129 = dma.done.wait [#allocation6 + $0x1], 16 }
 0x8df   :  { %3130 = vsyncadd [#allocation6 + $0x1], 4294967280  ;;  %v3142_v55 = vmov 0.0|0.0   ;;  %vm3143_vm0 = vmmov 0   ;;  %v2033_v61 = vld [vmem:[#allocation4] sm:$0xff]  ;;  %v2034_v62 = vld [vmem:[#allocation4 + $0x8] sm:$0xff] }
 0x8e0   :  { %2823 = vmatprep.subr.bf16.mxu0 %v3142_v55  ;;  %2244 = vmatprep.mubr.msk.f32.mxu0 %vm3143_vm0, %v3138_v0  ;;  %v2035_v63 = vld [vmem:[#allocation4 + $0x10] sm:$0xff]  ;;  %v2824_v4 = vpack.c.bf16 %v2034_v62, %v2033_v61  ;;  %v2036_v10 = vld [vmem:[#allocation4 + $0x18] sm:$0xff]  ;;  %v2037_v12 = vld [vmem:[#allocation4 + $0x20] sm:$0xff]  ;;  %s3144_s5 = smov [#allocation13]  }
 0x8e1   :  { %v2827_v11 = vpack.c.bf16 %v2036_v10, %v2035_v63  ;;  %v2038_v16 = vld [vmem:[#allocation4 + $0x28] sm:$0xff]  ;;  %v2039_v23 = vld [vmem:[#allocation4 + $0x30] sm:$0xff]  ;;  %v2040_v24 = vld [vmem:[#allocation4 + $0x38] sm:$0xff]  ;;  %s2145_s8 = sshll.u32 %s3144_s5, 4  ;;  %s2146_s8 = int_to_ptr.vmem [resolvable:$true] %s2145_s8 }
 0x8e2   :  { %2825 = vmatpush3.bf16.msra.mxu0 %v2824_v4  ;;  %v2830_v22 = vpack.c.bf16 %v2038_v16, %v2037_v12  ;;  %v2833_v28 = vpack.c.bf16 %v2040_v24, %v2039_v23  ;;  %v2041_v34 = vld [vmem:[#allocation4 + $0x40] sm:$0xff]  ;;  %v2042_v0 = vld [vmem:[#allocation4 + $0x48] sm:$0xff]  ;;  %v2043_v36 = vld [vmem:[#allocation4 + $0x50] sm:$0xff]  ;;  %s3101_s1 = scalar_lea.vmem %s2146_s8, 128  ;;  %p3106_p13 = scmp.lt.s32.totalorder %s2146_s8, %s2146_s8 }
 0x8e3   :  { %2826 = vmatprep.subr.bf16.mxu0 %v3142_v55  ;;  %v2836_v35 = vpack.c.bf16 %v2042_v0, %v2041_v34  ;;  %v2044_v41 = vld [vmem:[#allocation4 + $0x58] sm:$0xff]  ;;  %v2045_v52 = vld [vmem:[#allocation4 + $0x60] sm:$0xff]  ;;  %v2046_v53 = vld [vmem:[#allocation4 + $0x68] sm:$0xff]  ;;  %p3102_p12 = scmp.ne.s32.totalorder %s2146_s8, %s3101_s1  ;;  %p3107_p0 = scmp.lt.s32.totalorder %s3101_s1, %s3101_s1 }
 0x8e4   :  { %v2839_v48 = vpack.c.bf16 %v2044_v41, %v2043_v36  ;;  %v2842_v58 = vpack.c.bf16 %v2046_v53, %v2045_v52  ;;  %v2047_v5 = vld [vmem:[#allocation4 + $0x70] sm:$0xff]  ;;  %v2048_v6 = vld [vmem:[#allocation4 + $0x78] sm:$0xff]  ;;  %v2192_v17 = vld [vmem:[#allocation5] ss:$0 sm:$0xff] }
 0x8e5   :  { %v2845_v7 = vpack.c.bf16 %v2048_v6, %v2047_v5  ;;  %v2032_v13 = vld [vmem:[#allocation3] sm:$0xff]  ;;  %p3108_p1 = por %p3107_p0, %p3106_p13 }
 0x8e6   :  { %2828 = vmatpush3.bf16.msra.mxu0 %v2827_v11 }
 0x8e7   :  { %2829 = vmatprep.subr.bf16.mxu0 %v3142_v55  ;;  %p3109_p2 = pnand %p3108_p1, %p3102_p12 }
 0x8ea   :  { %2831 = vmatpush3.bf16.msra.mxu0 %v2830_v22 }
 0x8eb   :  { %2832 = vmatprep.subr.bf16.mxu0 %v3142_v55 }
 0x8ee   :  { %2834 = vmatpush3.bf16.msra.mxu0 %v2833_v28 }
 0x8ef   :  { %2835 = vmatprep.subr.bf16.mxu0 %v3142_v55 }
 0x8f2   :  { %2837 = vmatpush3.bf16.msra.mxu0 %v2836_v35 }
 0x8f3   :  { %2838 = vmatprep.subr.bf16.mxu0 %v3142_v55 }
 0x8f6   :  { %2840 = vmatpush3.bf16.msra.mxu0 %v2839_v48 }
 0x8f7   :  { %2841 = vmatprep.subr.bf16.mxu0 %v3142_v55 }
 0x8fa   :  { %2843 = vmatpush3.bf16.msra.mxu0 %v2842_v58 }
 0x8fb   :  { %2844 = vmatprep.subr.bf16.mxu0 %v3142_v55 }
 0x8fe   :  { %2846 = vmatpush3.bf16.msra.mxu0 %v2845_v7 }
 0x901   :  { %2245 = vmatmul.mubr.f32.vlgmr.msra.gmra.mrb[18].mxu0 %v2032_v13 }
 0x9d4   :  { %v2122_v18 = vpop.f32.mrb[18].mxu0 }
 0x9d5   :  { %v2123_v57 = vadd.f32 %v2192_v17, %v2122_v18  ;;  %v2246_v32 = vpop.f32.mrb[19].mxu0 }
 0x9d7   :  { %2126 = vmax.xlane.f32.xlu0 %v2123_v57 }
 0xa64   :  { %v2127_v33 = vpop.xlane.xlu0 %2126 }
 0xa65   :  { %v2128_v37 = vsub.f32 %v2123_v57, %v2127_v33 }
 0xa67   :  { %v2129_v39 = vmul.f32 1.442695, %v2128_v37 }
 0xa69   :  { %2987 = vpow2.f32 %v2129_v39 }
 0xa73   :  { %v2988_v40 = vpop.eup %2987 }
 0xa74   :  { %2131 = vadd.xlane.f32.xlu0 %v2988_v40 }
 0xb01   :  { %v2132_v43 = vpop.xlane.xlu0 %2131 }
 0xb02   :  { %2989 = vrcp.f32 %v2132_v43 }
 0xb0c   :  { %v2990_v44 = vpop.eup %2989 }
 0xb0d   :  { %v2134_v45 = vmul.f32 %v2990_v44, %v2132_v43 }
 0xb0f   :  { %v2135_v46 = vsub.f32 2.0, %v2134_v45 }
 0xb11   :  { %v2136_v47 = vmul.f32 %v2990_v44, %v2135_v46 }
 0xb13   :  { %v2137_v54 = vmul.f32 %v2988_v40, %v2136_v47 }
 0xb15   :  { %2138 = vst [vmem:[#allocation13] sm:$0xff] %v2137_v54 }
 0xb16   :  { %3112 = shalt.err (!%p3109_p2)
}
 0xb17   :  { %s3113_s9 = scalar_lea.hbm %s3663_s6, 128 }
 0xb18   :  { %p3114_p3 = scmp.ne.s32.totalorder %s3663_s6, %s3113_s9  ;;  %p3117_p4 = scmp.lt.u32.totalorder %s3113_s9, %s3663_s6 }
 0xb1a   :  { %p3119_p5 = pnand %p3117_p4, %p3114_p3 }
 0xb1c   :  { %3122 = shalt.err (!%p3119_p5)
}
 0xb1d   :  { %2148 = dma.vmem_to_hbm [thread:$0]  %s2146_s8, 128, %s3663_s6, [#allocation9]  }
 0xb1e   :  { %3131 = dma.done.wait [#allocation9], 128  }
 0xb1f   :  { %3132 = vsyncadd [#allocation9], 4294967168 }
 0xb20   :  { %2152 = vsyncpa [#allocation8], 1 }
 0xb21   :  { %2153 = vsyncpa [#allocation11], 1 }
 0xb22   :  { %2154 = vsyncpa [#allocation9], 1 }
 0xb23   :  { %2155 = vsyncmov [#allocation6] }
 0xb26   :  { %s2156_s15 = vpop.sfrf %2155 }
 0xb27   :  { %p2193_p6 = scmp.ne.s32.totalorder %s2156_s15, 0 }
 0xb29   :  { %2160 = shalt.err (%p2193_p6)  }
 0xb2a   :  { %2162 = vsyncmov [#allocation6 + $0x1] }
 0xb2d   :  { %s2163_s16 = vpop.sfrf %2162 }
 0xb2e   :  { %p2194_p7 = scmp.ne.s32.totalorder %s2163_s16, 0 }
 0xb30   :  { %2167 = shalt.err (%p2194_p7)  }

</bundles_post_ra>
